<compile_context>
chip_gen: v7x
topology: tpu7x:2x2x1
jax: 0.10.0
libtpu: 0.0.40
codegen_flags: <defaults>
</compile_context>

<pallas_src>
import functools

import jax
import jax.numpy as jnp
import numpy as np
from jax.experimental import pallas as pl
from jax.experimental.pallas import tpu as pltpu


def _rup(x, m):
    return ((x + m - 1) // m) * m


def _fno_kernel(n_layers, tb, s_p, inv_w, mdt,
                x_ref, wi_ref, bi_ref, lng_ref, lnb_ref, wrwi_ref,
                dft2_ref, idft2_ref, go_ref, bo_ref, wo_ref, bout_ref,
                o_ref, h_sc):
    """Full ImprovedFNO forward for TB batch elements (rows stacked as (b, s)).

    x_ref    : (TB*S_p, Din_p)             flattened+padded input block
    wi_ref   : (Din_p, W_p), bi_ref: (1, W_p)          fc_in
    lng_ref  : (L, 1, W_p), lnb_ref: (L, 1, W_p)       per-layer LayerNorm
    wrwi_ref : (L, 2*M_p, W_p)             [Wr ; Wi] fused spectral weights
    dft2_ref : (2*M_p, S_p)                [cos ; -sin] truncated rfft
    idft2_ref: (S_p, 2*M_p)                [ic , isr]   truncated irfft
    go/bo    : (1, W_p)                    norm_out
    wo_ref   : (W_p, Dout_p), bout_ref: (1, Dout_p)    fc_out
    o_ref    : (TB*S_p, Dout_p)            output block
    h_sc     : (TB*S_p, W_p) f32 VMEM scratch (activations / residual stream)
    """
    f32 = jnp.float32

    def layernorm(v, g, b):
        # One-pass stats (var = E[x^2] - mu^2); divisor is the TRUE width so the
        # zero-padded lanes do not perturb the statistics, and g/b padding keeps
        # padded lanes exactly zero.
        mu = jnp.sum(v, axis=-1, keepdims=True) * inv_w
        ex2 = jnp.sum(v * v, axis=-1, keepdims=True) * inv_w
        var = ex2 - mu * mu
        return (v - mu) * jax.lax.rsqrt(var + 1e-5) * g + b

    def mm(a, b):
        return jnp.dot(a.astype(mdt), b.astype(mdt), preferred_element_type=f32)

    # fc_in for all TB batch elements at once: (TB*S, Din) @ (Din, W)
    h_sc[...] = mm(x_ref[...], wi_ref[...]) + bi_ref[...]

    dft2 = dft2_ref[...].astype(mdt)      # hoisted, layer-invariant
    idft2 = idft2_ref[...].astype(mdt)

    def layer(l, carry):
        hn = layernorm(h_sc[...], lng_ref[l], lnb_ref[l])        # (TB*S, W)
        wl = wrwi_ref[l]                                         # (2M, W) f32
        for b in range(tb):                                      # static, aligned slices
            hb = hn[b * s_p:(b + 1) * s_p, :]                    # (S, W)
            # truncated rfft (Re;Im stacked) -> spectral scale -> truncated irfft
            ft = jnp.dot(dft2, hb.astype(mdt), preferred_element_type=f32)      # (2M, W)
            yb = jnp.dot(idft2, (ft * wl).astype(mdt),
                         preferred_element_type=f32)                            # (S, W)
            # dropout(p=0.0) is identity; add residual in place
            h_sc[b * s_p:(b + 1) * s_p, :] += yb
        return carry

    if n_layers > 4:
        jax.lax.fori_loop(0, n_layers, layer, 0)
    else:
        for l in range(n_layers):
            layer(l, 0)

    hn = layernorm(h_sc[...], go_ref[...], bo_ref[...])
    o_ref[...] = mm(hn, wo_ref[...]) + bout_ref[...]


def _build_dft(S, modes, S_p, M_p, dtype):
    """Truncated rfft / irfft as dense matrices, padded and Re/Im-fused."""
    n = np.arange(S, dtype=np.float64)[:, None]
    k = np.arange(modes, dtype=np.float64)[None, :]
    ang = 2.0 * np.pi * n * k / S
    cfT = np.cos(ang).T                              # (M, S)  Re(rfft)
    sfT = (-np.sin(ang)).T                           # (M, S)  Im(rfft)
    # irfft weighting: DC (and Nyquist for even S) counted once, others twice
    factor = np.where((k == 0) | ((S % 2 == 0) & (k == S // 2)), 1.0, 2.0)
    ic = factor * np.cos(ang) / S                    # (S, M)
    isr = -factor * np.sin(ang) / S                  # (S, M)

    def pad(a, r, c):
        out = np.zeros((r, c), np.float64)
        out[:a.shape[0], :a.shape[1]] = a
        return out

    dft2 = np.concatenate([pad(cfT, M_p, S_p), pad(sfT, M_p, S_p)], axis=0)   # (2M_p, S_p)
    idft2 = np.concatenate([pad(ic, S_p, M_p), pad(isr, S_p, M_p)], axis=1)   # (S_p, 2M_p)
    return jnp.asarray(dft2, dtype), jnp.asarray(idft2, dtype)


def _choose_tb(batch, per_elem_bytes, budget_bytes, max_tb=32):
    """Largest batch block that fits the VMEM budget and keeps >=2 grid steps."""
    divisors = [d for d in range(1, min(batch, max_tb) + 1) if batch % d == 0]
    viable = [d for d in divisors
              if d * per_elem_bytes <= budget_bytes and (batch // d >= 2 or batch == 1)]
    return max(viable) if viable else 1


def improved_fno_forward(x, params, *, modes, n_layers, use_bf16_matmul=False):
    B, S, Din = x.shape
    W = params["wi"].shape[1]
    Dout = params["wo"].shape[1]
    f32 = jnp.float32

    # padded sizes: lanes (last dim) -> 128, sublanes / modes -> 8
    S_p = _rup(S, 8)
    M_p = _rup(modes, 8)
    W_p = _rup(W, 128)
    Din_p = _rup(Din, 128)
    Dout_p = _rup(Dout, 128)

    w_dtype = jnp.bfloat16 if use_bf16_matmul else f32   # matmul-operand dtype
    mdt = w_dtype

    dft2, idft2 = _build_dft(S, modes, S_p, M_p, w_dtype)

    def pad2(a, r, c, dt=f32):
        return jnp.pad(a.astype(dt), ((0, r - a.shape[0]), (0, c - a.shape[1])))

    wi = pad2(params["wi"], Din_p, W_p, w_dtype)
    bi = pad2(params["bi"], 1, W_p)
    wo = pad2(params["wo"], W_p, Dout_p, w_dtype)
    bout = pad2(params["bout"], 1, Dout_p)
    go = pad2(params["go"], 1, W_p)
    bo = pad2(params["bo"], 1, W_p)
    ln_g = jnp.pad(params["ln_g"].astype(f32), ((0, 0), (0, 0), (0, W_p - W)))
    ln_b = jnp.pad(params["ln_b"].astype(f32), ((0, 0), (0, 0), (0, W_p - W)))
    wr = jnp.pad(params["wr"].astype(f32), ((0, 0), (0, M_p - modes), (0, W_p - W)))
    wim = jnp.pad(params["wim"].astype(f32), ((0, 0), (0, M_p - modes), (0, W_p - W)))
    wrwi = jnp.concatenate([wr, wim], axis=1)            # (L, 2*M_p, W_p)

    # flatten batch into the row (sublane) dim: rows are (b, s)
    x_p = jnp.pad(x.astype(f32), ((0, 0), (0, S_p - S), (0, Din_p - Din)))
    x2 = x_p.reshape(B * S_p, Din_p)

    # --- VMEM budgeting & batch-block choice (v7x has only 64 MiB/TC) --------
    weight_bytes = 4 * (Din_p * W_p + W_p * Dout_p + 2 * (2 * M_p) * S_p
                        + n_layers * 2 * M_p * W_p + (2 * n_layers + 4) * W_p + Dout_p)
    per_elem = 4 * S_p * (2 * Din_p + 2 * Dout_p + 6 * W_p)   # io double-buffers + live acts
    budget = (36 << 20) - 2 * weight_bytes
    TB = _choose_tb(B, per_elem, budget)
    grid = (B // TB,)

    kernel = functools.partial(_fno_kernel, n_layers, TB, S_p, 1.0 / W, mdt)

    def const(shape):
        return pl.BlockSpec(shape, lambda i, _n=len(shape): (0,) * _n)

    flops = int(2 * B * S_p * Din_p * W_p
                + n_layers * B * 4 * (2 * M_p) * S_p * W_p
                + 2 * B * S_p * W_p * Dout_p
                + (n_layers + 1) * 10 * B * S_p * W_p)
    bytes_accessed = int(4 * (x2.size + B * S_p * Dout_p) + weight_bytes)
    transcendentals = int((n_layers + 1) * B * S_p)

    out2 = pl.pallas_call(
        kernel,
        out_shape=jax.ShapeDtypeStruct((B * S_p, Dout_p), jnp.float32),
        grid=grid,
        in_specs=[
            pl.BlockSpec((TB * S_p, Din_p), lambda i: (i, 0)),
            const((Din_p, W_p)), const((1, W_p)),
            const((n_layers, 1, W_p)), const((n_layers, 1, W_p)),
            const((n_layers, 2 * M_p, W_p)),
            const((2 * M_p, S_p)), const((S_p, 2 * M_p)),
            const((1, W_p)), const((1, W_p)),
            const((W_p, Dout_p)), const((1, Dout_p)),
        ],
        out_specs=pl.BlockSpec((TB * S_p, Dout_p), lambda i: (i, 0)),
        scratch_shapes=[pltpu.VMEM((TB * S_p, W_p), jnp.float32)],
        compiler_params=pltpu.CompilerParams(
            dimension_semantics=("parallel",),
            vmem_limit_bytes=48 * 1024 * 1024),
        cost_estimate=pl.CostEstimate(
            flops=flops, transcendentals=transcendentals,
            bytes_accessed=bytes_accessed),
    )(x2, wi, bi, ln_g, ln_b, wrwi, dft2, idft2, go, bo, wo, bout)

    return out2.reshape(B, S_p, Dout_p)[:, :S, :Dout]


def reference_forward(x, params, *, modes, n_layers):
    """Pure-JAX reference matching the PyTorch module semantics exactly."""
    S = x.shape[1]

    def layernorm(v, g, b):
        mu = v.mean(-1, keepdims=True)
        var = ((v - mu) ** 2).mean(-1, keepdims=True)
        return (v - mu) / jnp.sqrt(var + 1e-5) * g + b

    h = x @ params["wi"] + params["bi"][0]            # (B, S, W)
    h = jnp.transpose(h, (0, 2, 1))                   # (B, W, S)
    for l in range(n_layers):
        res = h
        hn = layernorm(jnp.transpose(h, (0, 2, 1)),
                       params["ln_g"][l, 0], params["ln_b"][l, 0])
        hn = jnp.transpose(hn, (0, 2, 1))             # (B, W, S)
        ft = jnp.fft.rfft(hn, axis=-1)[:, :, :modes]
        wr = params["wr"][l]                          # (M, W)
        wim = params["wim"][l]
        out = ft.real * wr.T[None] + 1j * (ft.imag * wim.T[None])
        y = jnp.fft.irfft(out, n=S, axis=-1)
        h = y + res
    h = jnp.transpose(h, (0, 2, 1))                   # (B, S, W)
    h = layernorm(h, params["go"][0], params["bo"][0])
    return h @ params["wo"] + params["bout"][0]


def init_params(key, *, input_dim, width, output_dim, modes, n_layers):
    ks = jax.random.split(key, 8)
    scale = 1.0 / width ** 2
    return {
        "wi": jax.random.normal(ks[0], (input_dim, width), jnp.float32) / np.sqrt(input_dim),
        "bi": 0.01 * jax.random.normal(ks[1], (1, width), jnp.float32),
        "ln_g": jnp.ones((n_layers, 1, width), jnp.float32),
        "ln_b": jnp.zeros((n_layers, 1, width), jnp.float32),
        "wr": scale * jax.random.normal(ks[2], (n_layers, modes, width), jnp.float32),
        "wim": scale * jax.random.normal(ks[3], (n_layers, modes, width), jnp.float32),
        "go": jnp.ones((1, width), jnp.float32),
        "bo": jnp.zeros((1, width), jnp.float32),
        "wo": jax.random.normal(ks[4], (width, output_dim), jnp.float32) / np.sqrt(width),
        "bout": 0.01 * jax.random.normal(ks[5], (1, output_dim), jnp.float32),
    }


if __name__ == "__main__":
    # B=4 so the wrapper picks TB=2 (2 elems/grid step, 2 grid steps -> megacore ok)
    B, S, Din, W, M, Dout, L = 4, 16, 4, 32, 8, 4, 3

    key = jax.random.PRNGKey(0)
    kx, kp = jax.random.split(key)
    x = jax.random.normal(kx, (B, S, Din), jnp.float32)
    params = init_params(kp, input_dim=Din, width=W, output_dim=Dout,
                         modes=M, n_layers=L)

    ref = jax.block_until_ready(reference_forward(x, params, modes=M, n_layers=L))

    # f32 MXU path (default, v5e-friendly) — strict check
    out = jax.block_until_ready(
        improved_fno_forward(x, params, modes=M, n_layers=L))
    np.testing.assert_allclose(np.asarray(out), np.asarray(ref), rtol=1e-4, atol=2e-4)

    # bf16 MXU-input path (v6e/v7x fast path) — loose check
    out_bf16 = jax.block_until_ready(
        improved_fno_forward(x, params, modes=M, n_layers=L, use_bf16_matmul=True))
    np.testing.assert_allclose(np.asarray(out_bf16), np.asarray(ref), rtol=5e-2, atol=2e-1)

    print("KERNEL_OK")
</pallas_src>

<mosaic_0001>
module attributes {stable_mosaic.version = 11 : i64} {
  func.func @_fno_kernel(%arg0: i32, %arg1: memref<32x128xf32, #tpu.memory_space<vmem>>, %arg2: memref<128x128xf32, #tpu.memory_space<vmem>>, %arg3: memref<1x128xf32, #tpu.memory_space<vmem>>, %arg4: memref<3x1x128xf32, #tpu.memory_space<vmem>>, %arg5: memref<3x1x128xf32, #tpu.memory_space<vmem>>, %arg6: memref<3x16x128xf32, #tpu.memory_space<vmem>>, %arg7: memref<16x16xf32, #tpu.memory_space<vmem>>, %arg8: memref<16x16xf32, #tpu.memory_space<vmem>>, %arg9: memref<1x128xf32, #tpu.memory_space<vmem>>, %arg10: memref<1x128xf32, #tpu.memory_space<vmem>>, %arg11: memref<128x128xf32, #tpu.memory_space<vmem>>, %arg12: memref<1x128xf32, #tpu.memory_space<vmem>>, %arg13: memref<32x128xf32, #tpu.memory_space<vmem>>, %arg14: memref<32x128xf32, #tpu.memory_space<vmem>>) attributes {dimension_semantics = [#tpu.dimension_semantics<parallel>], iteration_bounds = array<i64: 2>, scalar_prefetch = 0 : i64, scratch_operands = 1 : i64, tpu.core_type = #tpu.core_type<tc>, window_params = [{transform_indices = @transform_0, window_bounds = array<i64: 32, 128>}, {pipeline_mode = #tpu.pipeline_mode<synchronous>, transform_indices = @transform_1, window_bounds = array<i64: 128, 128>}, {pipeline_mode = #tpu.pipeline_mode<synchronous>, transform_indices = @transform_2, window_bounds = array<i64: 1, 128>}, {pipeline_mode = #tpu.pipeline_mode<synchronous>, transform_indices = @transform_3, window_bounds = array<i64: 3, 1, 128>}, {pipeline_mode = #tpu.pipeline_mode<synchronous>, transform_indices = @transform_4, window_bounds = array<i64: 3, 1, 128>}, {pipeline_mode = #tpu.pipeline_mode<synchronous>, transform_indices = @transform_5, window_bounds = array<i64: 3, 16, 128>}, {pipeline_mode = #tpu.pipeline_mode<synchronous>, transform_indices = @transform_6, window_bounds = array<i64: 16, 16>}, {pipeline_mode = #tpu.pipeline_mode<synchronous>, transform_indices = @transform_7, window_bounds = array<i64: 16, 16>}, {pipeline_mode = #tpu.pipeline_mode<synchronous>, transform_indices = @transform_8, window_bounds = array<i64: 1, 128>}, {pipeline_mode = #tpu.pipeline_mode<synchronous>, transform_indices = @transform_9, window_bounds = array<i64: 1, 128>}, {pipeline_mode = #tpu.pipeline_mode<synchronous>, transform_indices = @transform_10, window_bounds = array<i64: 128, 128>}, {pipeline_mode = #tpu.pipeline_mode<synchronous>, transform_indices = @transform_11, window_bounds = array<i64: 1, 128>}, {transform_indices = @transform_12, window_bounds = array<i64: 32, 128>}]} {
    %c0 = arith.constant 0 : index
    %c0_0 = arith.constant 0 : index
    %0 = vector.load %arg1[%c0, %c0_0] : memref<32x128xf32, #tpu.memory_space<vmem>>, vector<32x128xf32>
    %c0_1 = arith.constant 0 : index
    %c0_2 = arith.constant 0 : index
    %1 = vector.load %arg2[%c0_1, %c0_2] : memref<128x128xf32, #tpu.memory_space<vmem>>, vector<128x128xf32>
    %cst = arith.constant dense<0.000000e+00> : vector<32x128xf32>
    %2 = tpu.matmul %0, %1, %cst {dimension_numbers = #tpu.dot_dimension_numbers<[1], [0], [0], [1], [0, 0, 1, 1], [], []>} : vector<32x128xf32>, vector<128x128xf32>, vector<32x128xf32> -> vector<32x128xf32>
    %c0_3 = arith.constant 0 : index
    %c0_4 = arith.constant 0 : index
    %3 = vector.load %arg3[%c0_3, %c0_4] : memref<1x128xf32, #tpu.memory_space<vmem>>, vector<1x128xf32>
    %4 = vector.broadcast %3 : vector<1x128xf32> to vector<32x128xf32>
    %5 = arith.addf %2, %4 : vector<32x128xf32>
    %c0_5 = arith.constant 0 : index
    %c0_6 = arith.constant 0 : index
    %6 = vector.load %arg14[%c0_5, %c0_6] : memref<32x128xf32, #tpu.memory_space<vmem>>, vector<32x128xf32>
    tpu.vector_store %arg14[%c0_5, %c0_6], %5 {strides = array<i32>} : memref<32x128xf32, #tpu.memory_space<vmem>>, vector<32x128xf32>,
    %c0_7 = arith.constant 0 : index
    %c0_8 = arith.constant 0 : index
    %7 = vector.load %arg7[%c0_7, %c0_8] : memref<16x16xf32, #tpu.memory_space<vmem>>, vector<16x16xf32>
    %c0_9 = arith.constant 0 : index
    %c0_10 = arith.constant 0 : index
    %8 = vector.load %arg8[%c0_9, %c0_10] : memref<16x16xf32, #tpu.memory_space<vmem>>, vector<16x16xf32>
    %c0_11 = arith.constant 0 : index
    %c0_12 = arith.constant 0 : index
    %9 = vector.load %arg14[%c0_11, %c0_12] : memref<32x128xf32, #tpu.memory_space<vmem>>, vector<32x128xf32>
    %c0_13 = arith.constant 0 : index
    %c0_14 = arith.constant 0 : index
    %c0_15 = arith.constant 0 : index
    %10 = vector.load %arg4[%c0_13, %c0_14, %c0_15] : memref<3x1x128xf32, #tpu.memory_space<vmem>>, vector<1x1x128xf32>
    %11 = vector.shape_cast %10 : vector<1x1x128xf32> to vector<1x128xf32>
    %c0_16 = arith.constant 0 : index
    %c0_17 = arith.constant 0 : index
    %c0_18 = arith.constant 0 : index
    %12 = vector.load %arg5[%c0_16, %c0_17, %c0_18] : memref<3x1x128xf32, #tpu.memory_space<vmem>>, vector<1x1x128xf32>
    %13 = vector.shape_cast %12 : vector<1x1x128xf32> to vector<1x128xf32>
    %cst_19 = arith.constant dense<0.000000e+00> : vector<32xf32>
    %14 = vector.multi_reduction <add>, %9, %cst_19 [1] : vector<32x128xf32> to vector<32xf32>
    %15 = vector.shape_cast %14 : vector<32xf32> to vector<32x1xf32>
    %cst_20 = arith.constant 3.125000e-02 : f32
    %16 = vector.broadcast %cst_20 : f32 to vector<32x1xf32>
    %17 = arith.mulf %15, %16 : vector<32x1xf32>
    %18 = arith.mulf %9, %9 : vector<32x128xf32>
    %cst_21 = arith.constant dense<0.000000e+00> : vector<32xf32>
    %19 = vector.multi_reduction <add>, %18, %cst_21 [1] : vector<32x128xf32> to vector<32xf32>
    %20 = vector.shape_cast %19 : vector<32xf32> to vector<32x1xf32>
    %cst_22 = arith.constant 3.125000e-02 : f32
    %21 = vector.broadcast %cst_22 : f32 to vector<32x1xf32>
    %22 = arith.mulf %20, %21 : vector<32x1xf32>
    %23 = arith.mulf %17, %17 : vector<32x1xf32>
    %24 = arith.subf %22, %23 : vector<32x1xf32>
    %25 = vector.broadcast %17 : vector<32x1xf32> to vector<32x128xf32>
    %26 = arith.subf %9, %25 : vector<32x128xf32>
    %cst_23 = arith.constant 9.99999974E-6 : f32
    %27 = vector.broadcast %cst_23 : f32 to vector<32x1xf32>
    %28 = arith.addf %24, %27 : vector<32x1xf32>
    %29 = math.rsqrt %28 : vector<32x1xf32>
    %30 = vector.broadcast %29 : vector<32x1xf32> to vector<32x128xf32>
    %31 = arith.mulf %26, %30 : vector<32x128xf32>
    %32 = vector.broadcast %11 : vector<1x128xf32> to vector<32x128xf32>
    %33 = arith.mulf %31, %32 : vector<32x128xf32>
    %34 = vector.broadcast %13 : vector<1x128xf32> to vector<32x128xf32>
    %35 = arith.addf %33, %34 : vector<32x128xf32>
    %c0_24 = arith.constant 0 : index
    %c0_25 = arith.constant 0 : index
    %c0_26 = arith.constant 0 : index
    %36 = vector.load %arg6[%c0_24, %c0_25, %c0_26] : memref<3x16x128xf32, #tpu.memory_space<vmem>>, vector<1x16x128xf32>
    %37 = vector.shape_cast %36 : vector<1x16x128xf32> to vector<16x128xf32>
    %38 = vector.extract_strided_slice %35 {offsets = [0, 0], sizes = [16, 128], strides = [1, 1]} : vector<32x128xf32> to vector<16x128xf32>
    %cst_27 = arith.constant dense<0.000000e+00> : vector<16x128xf32>
    %39 = tpu.matmul %7, %38, %cst_27 {dimension_numbers = #tpu.dot_dimension_numbers<[1], [0], [0], [1], [0, 0, 1, 1], [], []>} : vector<16x16xf32>, vector<16x128xf32>, vector<16x128xf32> -> vector<16x128xf32>
    %40 = arith.mulf %39, %37 : vector<16x128xf32>
    %cst_28 = arith.constant dense<0.000000e+00> : vector<16x128xf32>
    %41 = tpu.matmul %8, %40, %cst_28 {dimension_numbers = #tpu.dot_dimension_numbers<[1], [0], [0], [1], [0, 0, 1, 1], [], []>} : vector<16x16xf32>, vector<16x128xf32>, vector<16x128xf32> -> vector<16x128xf32>
    %c0_29 = arith.constant 0 : index
    %c0_30 = arith.constant 0 : index
    %42 = vector.load %arg14[%c0_29, %c0_30] : memref<32x128xf32, #tpu.memory_space<vmem>>, vector<16x128xf32>
    %43 = arith.addf %42, %41 : vector<16x128xf32>
    %c0_31 = arith.constant 0 : index
    %c0_32 = arith.constant 0 : index
    %44 = vector.load %arg14[%c0_31, %c0_32] : memref<32x128xf32, #tpu.memory_space<vmem>>, vector<16x128xf32>
    tpu.vector_store %arg14[%c0_31, %c0_32], %43 {strides = array<i32>} : memref<32x128xf32, #tpu.memory_space<vmem>>, vector<16x128xf32>,
    %45 = vector.extract_strided_slice %35 {offsets = [16, 0], sizes = [16, 128], strides = [1, 1]} : vector<32x128xf32> to vector<16x128xf32>
    %cst_33 = arith.constant dense<0.000000e+00> : vector<16x128xf32>
    %46 = tpu.matmul %7, %45, %cst_33 {dimension_numbers = #tpu.dot_dimension_numbers<[1], [0], [0], [1], [0, 0, 1, 1], [], []>} : vector<16x16xf32>, vector<16x128xf32>, vector<16x128xf32> -> vector<16x128xf32>
    %47 = arith.mulf %46, %37 : vector<16x128xf32>
    %cst_34 = arith.constant dense<0.000000e+00> : vector<16x128xf32>
    %48 = tpu.matmul %8, %47, %cst_34 {dimension_numbers = #tpu.dot_dimension_numbers<[1], [0], [0], [1], [0, 0, 1, 1], [], []>} : vector<16x16xf32>, vector<16x128xf32>, vector<16x128xf32> -> vector<16x128xf32>
    %c16 = arith.constant 16 : index
    %c0_35 = arith.constant 0 : index
    %49 = vector.load %arg14[%c16, %c0_35] : memref<32x128xf32, #tpu.memory_space<vmem>>, vector<16x128xf32>
    %50 = arith.addf %49, %48 : vector<16x128xf32>
    %c16_36 = arith.constant 16 : index
    %c0_37 = arith.constant 0 : index
    %51 = vector.load %arg14[%c16_36, %c0_37] : memref<32x128xf32, #tpu.memory_space<vmem>>, vector<16x128xf32>
    tpu.vector_store %arg14[%c16_36, %c0_37], %50 {strides = array<i32>} : memref<32x128xf32, #tpu.memory_space<vmem>>, vector<16x128xf32>,
    %c0_38 = arith.constant 0 : index
    %c0_39 = arith.constant 0 : index
    %52 = vector.load %arg14[%c0_38, %c0_39] : memref<32x128xf32, #tpu.memory_space<vmem>>, vector<32x128xf32>
    %c1 = arith.constant 1 : index
    %c0_40 = arith.constant 0 : index
    %c0_41 = arith.constant 0 : index
    %53 = vector.load %arg4[%c1, %c0_40, %c0_41] : memref<3x1x128xf32, #tpu.memory_space<vmem>>, vector<1x1x128xf32>
    %54 = vector.shape_cast %53 : vector<1x1x128xf32> to vector<1x128xf32>
    %c1_42 = arith.constant 1 : index
    %c0_43 = arith.constant 0 : index
    %c0_44 = arith.constant 0 : index
    %55 = vector.load %arg5[%c1_42, %c0_43, %c0_44] : memref<3x1x128xf32, #tpu.memory_space<vmem>>, vector<1x1x128xf32>
    %56 = vector.shape_cast %55 : vector<1x1x128xf32> to vector<1x128xf32>
    %cst_45 = arith.constant dense<0.000000e+00> : vector<32xf32>
    %57 = vector.multi_reduction <add>, %52, %cst_45 [1] : vector<32x128xf32> to vector<32xf32>
    %58 = vector.shape_cast %57 : vector<32xf32> to vector<32x1xf32>
    %cst_46 = arith.constant 3.125000e-02 : f32
    %59 = vector.broadcast %cst_46 : f32 to vector<32x1xf32>
    %60 = arith.mulf %58, %59 : vector<32x1xf32>
    %61 = arith.mulf %52, %52 : vector<32x128xf32>
    %cst_47 = arith.constant dense<0.000000e+00> : vector<32xf32>
    %62 = vector.multi_reduction <add>, %61, %cst_47 [1] : vector<32x128xf32> to vector<32xf32>
    %63 = vector.shape_cast %62 : vector<32xf32> to vector<32x1xf32>
    %cst_48 = arith.constant 3.125000e-02 : f32
    %64 = vector.broadcast %cst_48 : f32 to vector<32x1xf32>
    %65 = arith.mulf %63, %64 : vector<32x1xf32>
    %66 = arith.mulf %60, %60 : vector<32x1xf32>
    %67 = arith.subf %65, %66 : vector<32x1xf32>
    %68 = vector.broadcast %60 : vector<32x1xf32> to vector<32x128xf32>
    %69 = arith.subf %52, %68 : vector<32x128xf32>
    %cst_49 = arith.constant 9.99999974E-6 : f32
    %70 = vector.broadcast %cst_49 : f32 to vector<32x1xf32>
    %71 = arith.addf %67, %70 : vector<32x1xf32>
    %72 = math.rsqrt %71 : vector<32x1xf32>
    %73 = vector.broadcast %72 : vector<32x1xf32> to vector<32x128xf32>
    %74 = arith.mulf %69, %73 : vector<32x128xf32>
    %75 = vector.broadcast %54 : vector<1x128xf32> to vector<32x128xf32>
    %76 = arith.mulf %74, %75 : vector<32x128xf32>
    %77 = vector.broadcast %56 : vector<1x128xf32> to vector<32x128xf32>
    %78 = arith.addf %76, %77 : vector<32x128xf32>
    %c1_50 = arith.constant 1 : index
    %c0_51 = arith.constant 0 : index
    %c0_52 = arith.constant 0 : index
    %79 = vector.load %arg6[%c1_50, %c0_51, %c0_52] : memref<3x16x128xf32, #tpu.memory_space<vmem>>, vector<1x16x128xf32>
    %80 = vector.shape_cast %79 : vector<1x16x128xf32> to vector<16x128xf32>
    %81 = vector.extract_strided_slice %78 {offsets = [0, 0], sizes = [16, 128], strides = [1, 1]} : vector<32x128xf32> to vector<16x128xf32>
    %cst_53 = arith.constant dense<0.000000e+00> : vector<16x128xf32>
    %82 = tpu.matmul %7, %81, %cst_53 {dimension_numbers = #tpu.dot_dimension_numbers<[1], [0], [0], [1], [0, 0, 1, 1], [], []>} : vector<16x16xf32>, vector<16x128xf32>, vector<16x128xf32> -> vector<16x128xf32>
    %83 = arith.mulf %82, %80 : vector<16x128xf32>
    %cst_54 = arith.constant dense<0.000000e+00> : vector<16x128xf32>
    %84 = tpu.matmul %8, %83, %cst_54 {dimension_numbers = #tpu.dot_dimension_numbers<[1], [0], [0], [1], [0, 0, 1, 1], [], []>} : vector<16x16xf32>, vector<16x128xf32>, vector<16x128xf32> -> vector<16x128xf32>
    %c0_55 = arith.constant 0 : index
    %c0_56 = arith.constant 0 : index
    %85 = vector.load %arg14[%c0_55, %c0_56] : memref<32x128xf32, #tpu.memory_space<vmem>>, vector<16x128xf32>
    %86 = arith.addf %85, %84 : vector<16x128xf32>
    %c0_57 = arith.constant 0 : index
    %c0_58 = arith.constant 0 : index
    %87 = vector.load %arg14[%c0_57, %c0_58] : memref<32x128xf32, #tpu.memory_space<vmem>>, vector<16x128xf32>
    tpu.vector_store %arg14[%c0_57, %c0_58], %86 {strides = array<i32>} : memref<32x128xf32, #tpu.memory_space<vmem>>, vector<16x128xf32>,
    %88 = vector.extract_strided_slice %78 {offsets = [16, 0], sizes = [16, 128], strides = [1, 1]} : vector<32x128xf32> to vector<16x128xf32>
    %cst_59 = arith.constant dense<0.000000e+00> : vector<16x128xf32>
    %89 = tpu.matmul %7, %88, %cst_59 {dimension_numbers = #tpu.dot_dimension_numbers<[1], [0], [0], [1], [0, 0, 1, 1], [], []>} : vector<16x16xf32>, vector<16x128xf32>, vector<16x128xf32> -> vector<16x128xf32>
    %90 = arith.mulf %89, %80 : vector<16x128xf32>
    %cst_60 = arith.constant dense<0.000000e+00> : vector<16x128xf32>
    %91 = tpu.matmul %8, %90, %cst_60 {dimension_numbers = #tpu.dot_dimension_numbers<[1], [0], [0], [1], [0, 0, 1, 1], [], []>} : vector<16x16xf32>, vector<16x128xf32>, vector<16x128xf32> -> vector<16x128xf32>
    %c16_61 = arith.constant 16 : index
    %c0_62 = arith.constant 0 : index
    %92 = vector.load %arg14[%c16_61, %c0_62] : memref<32x128xf32, #tpu.memory_space<vmem>>, vector<16x128xf32>
    %93 = arith.addf %92, %91 : vector<16x128xf32>
    %c16_63 = arith.constant 16 : index
    %c0_64 = arith.constant 0 : index
    %94 = vector.load %arg14[%c16_63, %c0_64] : memref<32x128xf32, #tpu.memory_space<vmem>>, vector<16x128xf32>
    tpu.vector_store %arg14[%c16_63, %c0_64], %93 {strides = array<i32>} : memref<32x128xf32, #tpu.memory_space<vmem>>, vector<16x128xf32>,
    %c0_65 = arith.constant 0 : index
    %c0_66 = arith.constant 0 : index
    %95 = vector.load %arg14[%c0_65, %c0_66] : memref<32x128xf32, #tpu.memory_space<vmem>>, vector<32x128xf32>
    %c2 = arith.constant 2 : index
    %c0_67 = arith.constant 0 : index
    %c0_68 = arith.constant 0 : index
    %96 = vector.load %arg4[%c2, %c0_67, %c0_68] : memref<3x1x128xf32, #tpu.memory_space<vmem>>, vector<1x1x128xf32>
    %97 = vector.shape_cast %96 : vector<1x1x128xf32> to vector<1x128xf32>
    %c2_69 = arith.constant 2 : index
    %c0_70 = arith.constant 0 : index
    %c0_71 = arith.constant 0 : index
    %98 = vector.load %arg5[%c2_69, %c0_70, %c0_71] : memref<3x1x128xf32, #tpu.memory_space<vmem>>, vector<1x1x128xf32>
    %99 = vector.shape_cast %98 : vector<1x1x128xf32> to vector<1x128xf32>
    %cst_72 = arith.constant dense<0.000000e+00> : vector<32xf32>
    %100 = vector.multi_reduction <add>, %95, %cst_72 [1] : vector<32x128xf32> to vector<32xf32>
    %101 = vector.shape_cast %100 : vector<32xf32> to vector<32x1xf32>
    %cst_73 = arith.constant 3.125000e-02 : f32
    %102 = vector.broadcast %cst_73 : f32 to vector<32x1xf32>
    %103 = arith.mulf %101, %102 : vector<32x1xf32>
    %104 = arith.mulf %95, %95 : vector<32x128xf32>
    %cst_74 = arith.constant dense<0.000000e+00> : vector<32xf32>
    %105 = vector.multi_reduction <add>, %104, %cst_74 [1] : vector<32x128xf32> to vector<32xf32>
    %106 = vector.shape_cast %105 : vector<32xf32> to vector<32x1xf32>
    %cst_75 = arith.constant 3.125000e-02 : f32
    %107 = vector.broadcast %cst_75 : f32 to vector<32x1xf32>
    %108 = arith.mulf %106, %107 : vector<32x1xf32>
    %109 = arith.mulf %103, %103 : vector<32x1xf32>
    %110 = arith.subf %108, %109 : vector<32x1xf32>
    %111 = vector.broadcast %103 : vector<32x1xf32> to vector<32x128xf32>
    %112 = arith.subf %95, %111 : vector<32x128xf32>
    %cst_76 = arith.constant 9.99999974E-6 : f32
    %113 = vector.broadcast %cst_76 : f32 to vector<32x1xf32>
    %114 = arith.addf %110, %113 : vector<32x1xf32>
    %115 = math.rsqrt %114 : vector<32x1xf32>
    %116 = vector.broadcast %115 : vector<32x1xf32> to vector<32x128xf32>
    %117 = arith.mulf %112, %116 : vector<32x128xf32>
    %118 = vector.broadcast %97 : vector<1x128xf32> to vector<32x128xf32>
    %119 = arith.mulf %117, %118 : vector<32x128xf32>
    %120 = vector.broadcast %99 : vector<1x128xf32> to vector<32x128xf32>
    %121 = arith.addf %119, %120 : vector<32x128xf32>
    %c2_77 = arith.constant 2 : index
    %c0_78 = arith.constant 0 : index
    %c0_79 = arith.constant 0 : index
    %122 = vector.load %arg6[%c2_77, %c0_78, %c0_79] : memref<3x16x128xf32, #tpu.memory_space<vmem>>, vector<1x16x128xf32>
    %123 = vector.shape_cast %122 : vector<1x16x128xf32> to vector<16x128xf32>
    %124 = vector.extract_strided_slice %121 {offsets = [0, 0], sizes = [16, 128], strides = [1, 1]} : vector<32x128xf32> to vector<16x128xf32>
    %cst_80 = arith.constant dense<0.000000e+00> : vector<16x128xf32>
    %125 = tpu.matmul %7, %124, %cst_80 {dimension_numbers = #tpu.dot_dimension_numbers<[1], [0], [0], [1], [0, 0, 1, 1], [], []>} : vector<16x16xf32>, vector<16x128xf32>, vector<16x128xf32> -> vector<16x128xf32>
    %126 = arith.mulf %125, %123 : vector<16x128xf32>
    %cst_81 = arith.constant dense<0.000000e+00> : vector<16x128xf32>
    %127 = tpu.matmul %8, %126, %cst_81 {dimension_numbers = #tpu.dot_dimension_numbers<[1], [0], [0], [1], [0, 0, 1, 1], [], []>} : vector<16x16xf32>, vector<16x128xf32>, vector<16x128xf32> -> vector<16x128xf32>
    %c0_82 = arith.constant 0 : index
    %c0_83 = arith.constant 0 : index
    %128 = vector.load %arg14[%c0_82, %c0_83] : memref<32x128xf32, #tpu.memory_space<vmem>>, vector<16x128xf32>
    %129 = arith.addf %128, %127 : vector<16x128xf32>
    %c0_84 = arith.constant 0 : index
    %c0_85 = arith.constant 0 : index
    %130 = vector.load %arg14[%c0_84, %c0_85] : memref<32x128xf32, #tpu.memory_space<vmem>>, vector<16x128xf32>
    tpu.vector_store %arg14[%c0_84, %c0_85], %129 {strides = array<i32>} : memref<32x128xf32, #tpu.memory_space<vmem>>, vector<16x128xf32>,
    %131 = vector.extract_strided_slice %121 {offsets = [16, 0], sizes = [16, 128], strides = [1, 1]} : vector<32x128xf32> to vector<16x128xf32>
    %cst_86 = arith.constant dense<0.000000e+00> : vector<16x128xf32>
    %132 = tpu.matmul %7, %131, %cst_86 {dimension_numbers = #tpu.dot_dimension_numbers<[1], [0], [0], [1], [0, 0, 1, 1], [], []>} : vector<16x16xf32>, vector<16x128xf32>, vector<16x128xf32> -> vector<16x128xf32>
    %133 = arith.mulf %132, %123 : vector<16x128xf32>
    %cst_87 = arith.constant dense<0.000000e+00> : vector<16x128xf32>
    %134 = tpu.matmul %8, %133, %cst_87 {dimension_numbers = #tpu.dot_dimension_numbers<[1], [0], [0], [1], [0, 0, 1, 1], [], []>} : vector<16x16xf32>, vector<16x128xf32>, vector<16x128xf32> -> vector<16x128xf32>
    %c16_88 = arith.constant 16 : index
    %c0_89 = arith.constant 0 : index
    %135 = vector.load %arg14[%c16_88, %c0_89] : memref<32x128xf32, #tpu.memory_space<vmem>>, vector<16x128xf32>
    %136 = arith.addf %135, %134 : vector<16x128xf32>
    %c16_90 = arith.constant 16 : index
    %c0_91 = arith.constant 0 : index
    %137 = vector.load %arg14[%c16_90, %c0_91] : memref<32x128xf32, #tpu.memory_space<vmem>>, vector<16x128xf32>
    tpu.vector_store %arg14[%c16_90, %c0_91], %136 {strides = array<i32>} : memref<32x128xf32, #tpu.memory_space<vmem>>, vector<16x128xf32>,
    %c0_92 = arith.constant 0 : index
    %c0_93 = arith.constant 0 : index
    %138 = vector.load %arg14[%c0_92, %c0_93] : memref<32x128xf32, #tpu.memory_space<vmem>>, vector<32x128xf32>
    %c0_94 = arith.constant 0 : index
    %c0_95 = arith.constant 0 : index
    %139 = vector.load %arg9[%c0_94, %c0_95] : memref<1x128xf32, #tpu.memory_space<vmem>>, vector<1x128xf32>
    %c0_96 = arith.constant 0 : index
    %c0_97 = arith.constant 0 : index
    %140 = vector.load %arg10[%c0_96, %c0_97] : memref<1x128xf32, #tpu.memory_space<vmem>>, vector<1x128xf32>
    %cst_98 = arith.constant dense<0.000000e+00> : vector<32xf32>
    %141 = vector.multi_reduction <add>, %138, %cst_98 [1] : vector<32x128xf32> to vector<32xf32>
    %142 = vector.shape_cast %141 : vector<32xf32> to vector<32x1xf32>
    %cst_99 = arith.constant 3.125000e-02 : f32
    %143 = vector.broadcast %cst_99 : f32 to vector<32x1xf32>
    %144 = arith.mulf %142, %143 : vector<32x1xf32>
    %145 = arith.mulf %138, %138 : vector<32x128xf32>
    %cst_100 = arith.constant dense<0.000000e+00> : vector<32xf32>
    %146 = vector.multi_reduction <add>, %145, %cst_100 [1] : vector<32x128xf32> to vector<32xf32>
    %147 = vector.shape_cast %146 : vector<32xf32> to vector<32x1xf32>
    %cst_101 = arith.constant 3.125000e-02 : f32
    %148 = vector.broadcast %cst_101 : f32 to vector<32x1xf32>
    %149 = arith.mulf %147, %148 : vector<32x1xf32>
    %150 = arith.mulf %144, %144 : vector<32x1xf32>
    %151 = arith.subf %149, %150 : vector<32x1xf32>
    %152 = vector.broadcast %144 : vector<32x1xf32> to vector<32x128xf32>
    %153 = arith.subf %138, %152 : vector<32x128xf32>
    %cst_102 = arith.constant 9.99999974E-6 : f32
    %154 = vector.broadcast %cst_102 : f32 to vector<32x1xf32>
    %155 = arith.addf %151, %154 : vector<32x1xf32>
    %156 = math.rsqrt %155 : vector<32x1xf32>
    %157 = vector.broadcast %156 : vector<32x1xf32> to vector<32x128xf32>
    %158 = arith.mulf %153, %157 : vector<32x128xf32>
    %159 = vector.broadcast %139 : vector<1x128xf32> to vector<32x128xf32>
    %160 = arith.mulf %158, %159 : vector<32x128xf32>
    %161 = vector.broadcast %140 : vector<1x128xf32> to vector<32x128xf32>
    %162 = arith.addf %160, %161 : vector<32x128xf32>
    %c0_103 = arith.constant 0 : index
    %c0_104 = arith.constant 0 : index
    %163 = vector.load %arg11[%c0_103, %c0_104] : memref<128x128xf32, #tpu.memory_space<vmem>>, vector<128x128xf32>
    %cst_105 = arith.constant dense<0.000000e+00> : vector<32x128xf32>
    %164 = tpu.matmul %162, %163, %cst_105 {dimension_numbers = #tpu.dot_dimension_numbers<[1], [0], [0], [1], [0, 0, 1, 1], [], []>} : vector<32x128xf32>, vector<128x128xf32>, vector<32x128xf32> -> vector<32x128xf32>
    %c0_106 = arith.constant 0 : index
    %c0_107 = arith.constant 0 : index
    %165 = vector.load %arg12[%c0_106, %c0_107] : memref<1x128xf32, #tpu.memory_space<vmem>>, vector<1x128xf32>
    %166 = vector.broadcast %165 : vector<1x128xf32> to vector<32x128xf32>
    %167 = arith.addf %164, %166 : vector<32x128xf32>
    %c0_108 = arith.constant 0 : index
    %c0_109 = arith.constant 0 : index
    %168 = vector.load %arg13[%c0_108, %c0_109] : memref<32x128xf32, #tpu.memory_space<vmem>>, vector<32x128xf32>
    tpu.vector_store %arg13[%c0_108, %c0_109], %167 {strides = array<i32>} : memref<32x128xf32, #tpu.memory_space<vmem>>, vector<32x128xf32>,
    return
  }
  func.func @transform_0(%arg0: i32) -> (i32, i32) {
    %c0_i32 = arith.constant 0 : i32
    %c0_i32_0 = arith.constant 0 : i32
    return %arg0, %c0_i32 : i32, i32
  }
  func.func @transform_1(%arg0: i32) -> (i32, i32) {
    %c0_i32 = arith.constant 0 : i32
    %c0_i32_0 = arith.constant 0 : i32
    %c0_i32_1 = arith.constant 0 : i32
    return %c0_i32, %c0_i32_0 : i32, i32
  }
  func.func @transform_2(%arg0: i32) -> (i32, i32) {
    %c0_i32 = arith.constant 0 : i32
    %c0_i32_0 = arith.constant 0 : i32
    %c0_i32_1 = arith.constant 0 : i32
    return %c0_i32, %c0_i32_0 : i32, i32
  }
  func.func @transform_3(%arg0: i32) -> (i32, i32, i32) {
    %c0_i32 = arith.constant 0 : i32
    %c0_i32_0 = arith.constant 0 : i32
    %c0_i32_1 = arith.constant 0 : i32
    %c0_i32_2 = arith.constant 0 : i32
    return %c0_i32, %c0_i32_0, %c0_i32_1 : i32, i32, i32
  }
  func.func @transform_4(%arg0: i32) -> (i32, i32, i32) {
    %c0_i32 = arith.constant 0 : i32
    %c0_i32_0 = arith.constant 0 : i32
    %c0_i32_1 = arith.constant 0 : i32
    %c0_i32_2 = arith.constant 0 : i32
    return %c0_i32, %c0_i32_0, %c0_i32_1 : i32, i32, i32
  }
  func.func @transform_5(%arg0: i32) -> (i32, i32, i32) {
    %c0_i32 = arith.constant 0 : i32
    %c0_i32_0 = arith.constant 0 : i32
    %c0_i32_1 = arith.constant 0 : i32
    %c0_i32_2 = arith.constant 0 : i32
    return %c0_i32, %c0_i32_0, %c0_i32_1 : i32, i32, i32
  }
  func.func @transform_6(%arg0: i32) -> (i32, i32) {
    %c0_i32 = arith.constant 0 : i32
    %c0_i32_0 = arith.constant 0 : i32
    %c0_i32_1 = arith.constant 0 : i32
    return %c0_i32, %c0_i32_0 : i32, i32
  }
  func.func @transform_7(%arg0: i32) -> (i32, i32) {
    %c0_i32 = arith.constant 0 : i32
    %c0_i32_0 = arith.constant 0 : i32
    %c0_i32_1 = arith.constant 0 : i32
    return %c0_i32, %c0_i32_0 : i32, i32
  }
  func.func @transform_8(%arg0: i32) -> (i32, i32) {
    %c0_i32 = arith.constant 0 : i32
    %c0_i32_0 = arith.constant 0 : i32
    %c0_i32_1 = arith.constant 0 : i32
    return %c0_i32, %c0_i32_0 : i32, i32
  }
  func.func @transform_9(%arg0: i32) -> (i32, i32) {
    %c0_i32 = arith.constant 0 : i32
    %c0_i32_0 = arith.constant 0 : i32
    %c0_i32_1 = arith.constant 0 : i32
    return %c0_i32, %c0_i32_0 : i32, i32
  }
  func.func @transform_10(%arg0: i32) -> (i32, i32) {
    %c0_i32 = arith.constant 0 : i32
    %c0_i32_0 = arith.constant 0 : i32
    %c0_i32_1 = arith.constant 0 : i32
    return %c0_i32, %c0_i32_0 : i32, i32
  }
  func.func @transform_11(%arg0: i32) -> (i32, i32) {
    %c0_i32 = arith.constant 0 : i32
    %c0_i32_0 = arith.constant 0 : i32
    %c0_i32_1 = arith.constant 0 : i32
    return %c0_i32, %c0_i32_0 : i32, i32
  }
  func.func @transform_12(%arg0: i32) -> (i32, i32) {
    %c0_i32 = arith.constant 0 : i32
    %c0_i32_0 = arith.constant 0 : i32
    return %arg0, %c0_i32 : i32, i32
  }
}

</mosaic_0001>

<bundles_post_ra>
// kernel: tpu_custom_call.1
= control target key start
LH: loop header
LB: loop body
LE: loop exit
PB: predicated region body
PF: predicated region fallthrough
CT: control target
= control target key end

     0   :  { %s3552_s0 = inlined_call_operand.hbm [shape: f32[64,128], index: 0, kind: input, shape index: {}]   ;;  %s3553_s1 = inlined_call_operand.hbm [shape: f32[128,128], index: 1, kind: input, shape index: {}]   ;;  %s3554_s2 = inlined_call_operand.hbm [shape: f32[1,128], index: 2, kind: input, shape index: {}]   ;;  %s3555_s3 = inlined_call_operand.vmem [shape: f32[3,1,128], index: 3, kind: input, shape index: {}]   ;;  %s3556_s4 = inlined_call_operand.vmem [shape: f32[3,1,128], index: 4, kind: input, shape index: {}]   ;;  %s3557_s5 = inlined_call_operand.hbm [shape: f32[3,16,128], index: 5, kind: input, shape index: {}]   ;;  %s3558_s6 = inlined_call_operand.vmem [shape: f32[16,16], index: 6, kind: input, shape index: {}]   ;;  %s3559_s7 = inlined_call_operand.hbm [shape: f32[16,16], index: 7, kind: input, shape index: {}]   ;;  %s3560_s8 = inlined_call_operand.vmem [shape: f32[1,128], index: 8, kind: input, shape index: {}]   ;;  %s3561_s9 = inlined_call_operand.vmem [shape: f32[1,128], index: 9, kind: input, shape index: {}]   ;;  %s3562_s10 = inlined_call_operand.hbm [shape: f32[128,128], index: 10, kind: input, shape index: {}]   ;;  %s3563_s11 = inlined_call_operand.vmem [shape: f32[1,128], index: 11, kind: input, shape index: {}]   ;;  %s3564_s12 = inlined_call_operand.hbm [shape: f32[64,128], index: 12, kind: output, shape index: {}]  }
   0x1   :  { %3572 = sst [smem:[#allocation20_spill]] %s3553_s1 }
   0x2   :  { %3573 = sst [smem:[#allocation21_spill]] %s3560_s8 }
   0x3   :  { %3574 = sst [smem:[#allocation22_spill]] %s3561_s9 }
   0x4   :  { %3575 = sst [smem:[#allocation23_spill]] %s3563_s11 }
   0x5   :  { %3576 = sst [smem:[#allocation24_spill]] %s3564_s12 }
   0x6   :  { %17 = vsyncpa [#allocation4], 0 }
   0x7   :  { %19 = vsyncpa [#allocation4 + $0x1], 0 }
   0x8   :  { %20 = vsyncpa [#allocation7], 0 }
   0x9   :  { %21 = vsyncpa [#allocation10], 0 }
   0xa   :  { %22 = vsyncpa [#allocation13], 0 }
   0xb   :  { %23 = vsyncpa [#allocation5], 0 }
   0xc   :  { %25 = vsyncpa [#allocation5 + $0x1], 0  ;;  %s3040_s21 = smov 0   ;;  %s3042_s22 = smov 0  }
   0xd   :  { %s3044_s23 = smov 0   ;;  %s3046_s24 = smov 0  }
   0xe LB: > { %s2964_s25 = smov [#allocation6]   ;;  %s3061_s27 = sadd.s32 4294967295, %s2962_s24   ;;  %s2962_s24 = sphi %s3046_s24, %s3605_s24   ;;  %s2958_s23 = sphi %s3044_s23, %s3604_s23   ;;  %s2954_s22 = sphi %s3042_s22, %s3603_s22   ;;  %s2950_s21 = sphi %s3040_s21, %s3602_s21  }
   0xf   : > { %s331_s26 = sshll.u32 %s2964_s25, 4  ;;  %p2158_p0 = scmp.ge.s32.totalorder %s2962_s24, 1  ;;  %s3066_s26 = int_to_ptr.vmem [resolvable:$true] %s331_s26 }
  0x10   : > { %p3568_p1 = scmp.eq.s32.totalorder %s3061_s27, 0  ;;  %p319_p2 = scmp.lt.s32.totalorder %s2962_s24, 3 }
  0x11   : > { %s2965_s29 = smov [#allocation9]   ;;  %s2966_s14 = smov [#allocation8]  }
  0x12   : > { %p3068_p3 = pnand %p2158_p0, %p319_p2  ;;  %s361_s30 = sshll.u32 %s2965_s29, 4  ;;  %s3081_s30 = int_to_ptr.vmem [resolvable:$true] %s361_s30 }
  0x13   : > { %s345_s15 = sshll.u32 %s2966_s14, 4  ;;  %s3579_s1 = sld [smem:[#allocation20_spill]]  ;;  %s3083_s15 = int_to_ptr.vmem [resolvable:$true] %s345_s15 }
  0x14   : > { %s3577_s28 = scalar_select %p3068_p3, 1, 0 }
  0x15   : > { %p2605_p5 = pneg %p3068_p3 }
  0x17   : > { %p3077_p6 = pnand %p2605_p5, %p3568_p1 }
  0x19   : > { %s2714_s18 = scalar_lea.hbm %s3579_s1, 2048  ;;  %p3093_p8 = pneg %p3077_p6 }
  0x1a   : > { %p2715_p7 = scmp.ne.s32.totalorder %s3579_s1, %s2714_s18  ;;  %p2721_p11 = scmp.lt.u32.totalorder %s2714_s18, %s3579_s1 }
  0x1c   : > { %p2717_p9 = pnand %p3093_p8, %p2715_p7 }
  0x1e   : > { %p2718_p10 = pneg %p2717_p9 }
  0x20   : > { %p2723_p12 = pnand %p2721_p11, %p2718_p10 }
  0x22   : > { %2726 = shalt.err (!%p2723_p12)
}
  0x23   : > { %s2727_s16 = scalar_lea.vmem %s3066_s26, 2048  ;;  %p2735_p5 = scmp.lt.s32.totalorder %s3066_s26, %s3066_s26 }
  0x24   : > { %p2728_p13 = scmp.ne.s32.totalorder %s3066_s26, %s2727_s16  ;;  %p2736_p4 = scmp.lt.s32.totalorder %s2727_s16, %s2727_s16 }
  0x26   : > { %p2730_p0 = pnand %p2728_p13, %p3093_p8  ;;  %p2737_p7 = por %p2736_p4, %p2735_p5 }
  0x28   : > { %p2731_p2 = pneg %p2730_p0 }
  0x2a   : > { %p2738_p9 = pnand %p2737_p7, %p2731_p2 }
  0x2c   : > { %2741 = shalt.err (!%p2738_p9)
}
  0x2d   : > { %s3566_s17 = smov 128   ;;  %s3570_s18 = smov 8  }
  0x2e   : > { %2608 = dma.hbm_to_vmem [thread:$0]  (!%p3077_p6), %s3579_s1, 2048, %s3066_s26, [#allocation7], %s3566_s17, %s3566_s17, %s3570_s18  }
  0x2f   : > { %s2742_s16 = scalar_lea.hbm %s3557_s5, 768 }
  0x30   : > { %p2743_p4 = scmp.ne.s32.totalorder %s3557_s5, %s2742_s16  ;;  %p2749_p12 = scmp.lt.u32.totalorder %s2742_s16, %s3557_s5 }
  0x32   : > { %p2745_p10 = pnand %p2743_p4, %p3093_p8 }
  0x34   : > { %p2746_p11 = pneg %p2745_p10 }
  0x36   : > { %p2751_p13 = pnand %p2749_p12, %p2746_p11 }
  0x38   : > { %2754 = shalt.err (!%p2751_p13)
}
  0x39   : > { %s2755_s26 = scalar_lea.vmem %s3081_s30, 768  ;;  %p2763_p7 = scmp.lt.s32.totalorder %s3081_s30, %s3081_s30 }
  0x3a   : > { %p2756_p0 = scmp.ne.s32.totalorder %s3081_s30, %s2755_s26  ;;  %p2764_p9 = scmp.lt.s32.totalorder %s2755_s26, %s2755_s26 }
  0x3c   : > { %p2758_p2 = pnand %p2756_p0, %p3093_p8  ;;  %p2765_p4 = por %p2764_p9, %p2763_p7 }
  0x3e   : > { %p2759_p5 = pneg %p2758_p2 }
  0x40   : > { %p2766_p10 = pnand %p2765_p4, %p2759_p5 }
  0x42   : > { %2769 = shalt.err (!%p2766_p10)
}
  0x43   : > { %2614 = dma.hbm_to_vmem [thread:$0]  (!%p3077_p6), %s3557_s5, 768, %s3081_s30, [#allocation10], %s3566_s17, %s3566_s17, %s3570_s18  }
  0x44   : > { %s2770_s19 = scalar_lea.hbm %s3554_s2, 16 }
  0x45   : > { %p2771_p11 = scmp.ne.s32.totalorder %s3554_s2, %s2770_s19  ;;  %p2777_p0 = scmp.lt.u32.totalorder %s2770_s19, %s3554_s2 }
  0x47   : > { %p2773_p12 = pnand %p2771_p11, %p3093_p8 }
  0x49   : > { %p2774_p13 = pneg %p2773_p12 }
  0x4b   : > { %p2779_p2 = pnand %p2777_p0, %p2774_p13 }
  0x4d   : > { %2782 = shalt.err (!%p2779_p2)
}
  0x4e   : > { %s2783_s30 = scalar_lea.vmem %s3083_s15, 16  ;;  %s2790_s26 = scalar_lea.vmem %s3083_s15, 32 }
  0x4f   : > { %p2784_p5 = scmp.ne.s32.totalorder %s3083_s15, %s2783_s30  ;;  %p2791_p4 = scmp.lt.s32.totalorder %s3083_s15, %s3083_s15 }
  0x50   : > { %p2792_p10 = scmp.lt.s32.totalorder %s2790_s26, %s2783_s30 }
  0x51   : > { %p2786_p7 = pnand %p2784_p5, %p3093_p8 }
  0x52   : > { %p2793_p11 = por %p2792_p10, %p2791_p4 }
  0x53   : > { %p2787_p9 = pneg %p2786_p7 }
  0x55   : > { %p2794_p12 = pnand %p2793_p11, %p2787_p9 }
  0x57   : > { %2797 = shalt.err (!%p2794_p12)
}
  0x58   : > { %2611 = dma.hbm_to_vmem [thread:$0]  (!%p3077_p6), %s3554_s2, 16, %s3083_s15, [#allocation7]  }
  0x59   : > { %s2969_s11 = smov [#allocation11]   ;;  %s2970_s19 = smov [#allocation12]  }
  0x5a   : > { %s377_s12 = sshll.u32 %s2969_s11, 4  ;;  %s396_s20 = sshll.u32 %s2970_s19, 4  ;;  %s378_s12 = int_to_ptr.vmem [resolvable:$true] %s377_s12  ;;  %s397_s20 = int_to_ptr.vmem [resolvable:$true] %s396_s20 }
  0x5b   : > { %s2798_s16 = scalar_lea.hbm %s3559_s7, 256 }
  0x5c   : > { %p2799_p13 = scmp.ne.s32.totalorder %s3559_s7, %s2798_s16  ;;  %p2805_p5 = scmp.lt.u32.totalorder %s2798_s16, %s3559_s7 }
  0x5e   : > { %p2801_p0 = pnand %p2799_p13, %p3093_p8 }
  0x60   : > { %p2802_p2 = pneg %p2801_p0 }
  0x62   : > { %p2807_p7 = pnand %p2805_p5, %p2802_p2 }
  0x64   : > { %2810 = shalt.err (!%p2807_p7)
}
  0x65   : > { %s2811_s15 = scalar_lea.vmem %s378_s12, 256  ;;  %p2819_p11 = scmp.lt.s32.totalorder %s378_s12, %s378_s12 }
  0x66   : > { %p2812_p9 = scmp.ne.s32.totalorder %s378_s12, %s2811_s15  ;;  %p2820_p12 = scmp.lt.s32.totalorder %s2811_s15, %s2811_s15 }
  0x68   : > { %p2814_p4 = pnand %p2812_p9, %p3093_p8  ;;  %p2821_p1 = por %p2820_p12, %p2819_p11 }
  0x6a   : > { %p2815_p10 = pneg %p2814_p4 }
  0x6c   : > { %p2822_p3 = pnand %p2821_p1, %p2815_p10 }
  0x6e   : > { %2825 = shalt.err (!%p2822_p3)
}
  0x6f   : > { %s3581_s9 = smov 128   ;;  %s2826_s14 = scalar_lea.hbm %s3562_s10, 2048 }
  0x70   : > { %2617 = dma.hbm_to_vmem [thread:$0]  (!%p3077_p6), %s3559_s7, 256, %s378_s12, [#allocation10], %s3581_s9, %s3581_s9, %s3570_s18  }
  0x71   : > { %p2827_p1 = scmp.ne.s32.totalorder %s3562_s10, %s2826_s14  ;;  %p2833_p0 = scmp.lt.u32.totalorder %s2826_s14, %s3562_s10 }
  0x73   : > { %p2829_p3 = pnand %p2827_p1, %p3093_p8 }
  0x75   : > { %p2830_p13 = pneg %p2829_p3 }
  0x77   : > { %p2835_p2 = pnand %p2833_p0, %p2830_p13 }
  0x79   : > { %2838 = shalt.err (!%p2835_p2)
}
  0x7a   : > { %s2839_s15 = scalar_lea.vmem %s397_s20, 2048  ;;  %p2847_p4 = scmp.lt.s32.totalorder %s397_s20, %s397_s20 }
  0x7b   : > { %p2840_p5 = scmp.ne.s32.totalorder %s397_s20, %s2839_s15  ;;  %p2848_p10 = scmp.lt.s32.totalorder %s2839_s15, %s2839_s15 }
  0x7d   : > { %p2842_p7 = pnand %p2840_p5, %p3093_p8  ;;  %p2849_p11 = por %p2848_p10, %p2847_p4 }
  0x7f   : > { %p2843_p9 = pneg %p2842_p7 }
  0x81   : > { %p2850_p12 = pnand %p2849_p11, %p2843_p9 }
  0x83   : > { %2853 = shalt.err (!%p2850_p12)
}
  0x84   : > { %2620 = dma.hbm_to_vmem [thread:$0]  (!%p3077_p6), %s3562_s10, 2048, %s397_s20, [#allocation13], %s3581_s9, %s3581_s9, %s3570_s18  }
  0x85   : > { %s2157_s13 = sadd.s32 4294967294, %s2962_s24   ;;  %s3211_s25 = sadd.s32 1, %s2962_s24  }
  0x86   : > { %s38_s11 = sadd.s32 1, %s2958_s23  ;;  %s35_s19 = ssub.s32 %s2962_s24, %s3211_s25 }
  0x87   : > { %p45_p8 = scmp.ne.s32.totalorder %s2958_s23, %s2954_s22  ;;  %p36_p1 = scmp.eq.s32.totalorder %s35_s19, 0 }
  0x88   : > { %p46_p3 = scmp.eq.s32.totalorder %s2962_s24, 0  ;;  %p51_p13 = scmp.ne.s32.totalorder %s2954_s22, %s2950_s21 }
  0x89   : > { %p306_p0 = scmp.eq.s32.totalorder %s3061_s27, 1  ;;  %p3582_p5 = scmp.eq.s32.totalorder %s3061_s27, 0 }
  0x8a   : > { %s3223_s29 = scalar_select %p36_p1, %s2958_s23, %s38_s11  }
  0x8b   : > { %p47_p2 = por %p46_p3, %p45_p8  ;;  %p3227_p7 = por %p3582_p5, %p51_p13 }
  0x8c   : > { %p3231_p6 = por %p306_p0, %p45_p8  ;;  %p312_p9 = scmp.eq.s32.totalorder %s2157_s13, 1 }
  0x8d   : > { %p2634_p4 = scmp.lt.s32.totalorder %s2962_s24, 2  ;;  %s413_s16 = sand.u32 1, %s2958_s23  }
  0x8e   : > { %s3584_s20 = scalar_select %p3231_p6, 1, 0 }
  0x8f   : > { %p3237_p10 = por %p312_p9, %p51_p13  ;;  %s2165_s26 = sshll.u32 %s413_s16, 5 }
  0x90   : > { %s2219_s8 = sshll.u32 %s2962_s24, 9  ;;  %s417_s11 = scalar_lea.vmem [#allocation3], %s2165_s26 }
  0x91   : > { %s3585_s30 = scalar_select %p3237_p10, 1, 0 }
  0x92   : > { %s3245_s17 = scalar_lea.hbm %s3552_s0, %s2219_s8  ;;  %s424_s19 = sshll.u32 %s417_s11, 4  ;;  %s3251_s19 = int_to_ptr.vmem [resolvable:$true] %s424_s19 }
  0x93   : > { %p3247_p11 = pnand %p2634_p4, %p47_p2  ;;  %s3253_s18 = scalar_lea.sflag [#allocation4], %s413_s16 }
  0x94   : > { %s2854_s1 = scalar_lea.hbm %s3245_s17, 512  ;;  %s2859_s15 = scalar_lea.hbm %s3552_s0, 1024 }
  0x95   : > { %p2855_p12 = scmp.ne.s32.totalorder %s3245_s17, %s2854_s1  ;;  %p2856_p8 = pneg %p3247_p11 }
  0x96   : > { %p2860_p13 = scmp.lt.u32.totalorder %s3245_s17, %s3552_s0  ;;  %p2861_p0 = scmp.lt.u32.totalorder %s2859_s15, %s2854_s1 }
  0x97   : > { %p2857_p1 = pnand %p2856_p8, %p2855_p12  ;;  %p2863_p5 = scmp.lt.u32.totalorder %s2854_s1, %s3245_s17 }
  0x98   : > { %p2862_p2 = por %p2861_p0, %p2860_p13 }
  0x99   : > { %p2858_p3 = pneg %p2857_p1 }
  0x9a   : > { %p2864_p9 = por %p2863_p5, %p2862_p2 }
  0x9c   : > { %p2865_p4 = pnand %p2864_p9, %p2858_p3 }
  0x9e   : > { %2868 = shalt.err (!%p2865_p4)
}
  0x9f   : > { %s2869_s16 = scalar_lea.vmem %s3251_s19, 512  ;;  %s2971_s26 = smov [#allocation3]  }
  0xa0   : > { %p2870_p12 = scmp.ne.s32.totalorder %s3251_s19, %s2869_s16  ;;  %s2874_s8 = sshll.u32 %s2971_s26, 4  ;;  %s2875_s8 = int_to_ptr.vmem [resolvable:$false] %s2874_s8 }
  0xa1   : > { %s2876_s12 = scalar_lea.vmem %s2875_s8, 1024  ;;  %p2877_p6 = scmp.lt.s32.totalorder %s3251_s19, %s2875_s8 }
  0xa2   : > { %p2872_p1 = pnand %p2870_p12, %p2856_p8  ;;  %p2878_p13 = scmp.lt.s32.totalorder %s2876_s12, %s2869_s16 }
  0xa4   : > { %p2873_p10 = pneg %p2872_p1  ;;  %p2879_p0 = por %p2878_p13, %p2877_p6 }
  0xa6   : > { %p2880_p2 = pnand %p2879_p0, %p2873_p10 }
  0xa8   : > { %2883 = shalt.err (!%p2880_p2)
}
  0xa9   : > { %s3587_s1 = smov 8   ;;  %p3588_p8 = scmp.ne.s32.totalorder %s3577_s28, 0 }
  0xaa   : > { %2624 = dma.hbm_to_vmem [thread:$0]  (!%p3247_p11), %s3245_s17, 512, %s3251_s19, %s3253_s18, %s3581_s9, %s3581_s9, %s3587_s1  }
  0xab   : > { %436 = sbr.rel (%p3588_p8) target bundleno = 2899 (0xb53), region = 68  ;;  %s3287_s15 = sand.u32 (!%p3588_p8), 1, %s2954_s22  }
  0xac   : > { %s2169_s11 = sshll.u32 (!%p3588_p8), %s3287_s15, 5  ;;  %s439_s16 = scalar_lea.sflag (!%p3588_p8), [#allocation4], %s3287_s15 }
  0xad   : > { %s3293_s13 = scalar_lea.vmem (!%p3588_p8), [#allocation3], %s2169_s11 }
  0xb2   : > { %2929 = dma.done.wait (%p3227_p7), %s439_s16, 512  }
  0xb3   : > { %2931 = vsyncadd (%p3227_p7), %s439_s16, 4294966784  ;;  %p3589_p6 = scmp.eq.s32.totalorder %s3061_s27, 0 }
  0xb5   : > { %2933 = dma.done.wait (%p3589_p6), [#allocation7], 2064   ;;  %p3590_p10 = pmov %p3589_p6 }
  0xb6   : > { %p3591_p11 = pmov %p3589_p6 }
  0xb7   : > { %2935 = vsyncadd (%p3590_p10), [#allocation7], 4294965232 }
  0xb8   : > { %2937 = dma.done.wait (%p3591_p11), [#allocation10], 1024   ;;  %p3592_p3 = pmov %p3589_p6 }
  0xba   : > { %2939 = vsyncadd (%p3592_p3), [#allocation10], 4294966272  ;;  %p3593_p5 = pmov %p3592_p3 }
  0xbb   : > { %p3594_p9 = pmov %p3592_p3 }
  0xbc   : > { %2941 = dma.done.wait (%p3593_p5), [#allocation13], 2048  }
  0xbd   : > { %2943 = vsyncadd (%p3594_p9), [#allocation13], 4294965248  ;;  %v509_v0 = vld [vmem:[#allocation6] sm:$0xff]  ;;  %v510_v1 = vld [vmem:[#allocation6 + $0x8] sm:$0xff]  ;;  %vm705_vm0 = vcmask 130048   ;;  %s3595_s26 = sld [smem:[#allocation21_spill]] }
  0xbe   : > { %v511_v2 = vld [vmem:[#allocation6 + $0x10] sm:$0xff]  ;;  %v2469_v3 = vpack.c.bf16 %v510_v1, %v509_v0  ;;  %v512_v4 = vld [vmem:[#allocation6 + $0x18] sm:$0xff]  ;;  %v513_v6 = vld [vmem:[#allocation6 + $0x20] sm:$0xff]  ;;  %s3596_s1 = sld [smem:[#allocation22_spill]]  ;;  %s3597_s28 = sld [smem:[#allocation23_spill]] }
  0xbf   : > { %v2473_v5 = vpack.c.bf16 %v512_v4, %v511_v2  ;;  %v514_v7 = vld [vmem:[#allocation6 + $0x28] sm:$0xff]  ;;  %v505_v9 = vld [vmem:[%s3293_s13] sm:$0xff]  ;;  %v515_v10 = vld [vmem:[#allocation6 + $0x30] sm:$0xff]  ;;  %s502_s18 = scalar_lea.vmem [#allocation14], %s2169_s11  ;;  %s2220_s14 = sshll.u32 %s3061_s27, 9 }
  0xc0   : > { %2470 = vmatprep.subr.bf16.mxu0 %v2469_v3  ;;  %v2477_v8 = vpack.c.bf16 %v514_v7, %v513_v6  ;;  %v516_v11 = vld [vmem:[#allocation6 + $0x38] sm:$0xff]  ;;  %2341 = vmatprep.mubr.f32.mxu0 %v505_v9  ;;  %v517_v13 = vld [vmem:[#allocation6 + $0x40] sm:$0xff]  ;;  %v518_v14 = vld [vmem:[#allocation6 + $0x48] sm:$0xff]  ;;  %s2036_s9 = sshll.u32 %s502_s18, 4  ;;  %s3598_s19 = sld [smem:[#allocation24_spill]]  ;;  %s3503_s9 = int_to_ptr.vmem [resolvable:$true] %s2036_s9 }
  0xc1   : > { %2472 = vmatpush3.bf16.msra.mxu0 %v2469_v3  ;;  %v2481_v12 = vpack.c.bf16 %v516_v11, %v515_v10  ;;  %v2485_v15 = vpack.c.bf16 %v518_v14, %v517_v13  ;;  %v519_v16 = vld [vmem:[#allocation6 + $0x50] sm:$0xff]  ;;  %v520_v17 = vld [vmem:[#allocation6 + $0x58] sm:$0xff]  ;;  %v521_v19 = vld [vmem:[#allocation6 + $0x60] sm:$0xff]  ;;  %s2023_s8 = scalar_lea.sflag [#allocation5], %s3287_s15  ;;  %s2884_s12 = scalar_lea.vmem %s3503_s9, 512 }
  0xc2   : > { %2474 = vmatprep.subr.bf16.mxu0 %v2473_v5  ;;  %v2489_v18 = vpack.c.bf16 %v520_v17, %v519_v16  ;;  %v522_v20 = vld [vmem:[#allocation6 + $0x68] sm:$0xff]  ;;  %v523_v22 = vld [vmem:[#allocation6 + $0x70] sm:$0xff]  ;;  %v524_v23 = vld [vmem:[#allocation6 + $0x78] sm:$0xff]  ;;  %p2885_p7 = scmp.ne.s32.totalorder %s3503_s9, %s2884_s12  ;;  %p3599_p4 = scmp.ne.s32.totalorder %s3584_s20, 0 }
  0xc3   : > { %v2493_v21 = vpack.c.bf16 %v522_v20, %v521_v19  ;;  %v2497_v24 = vpack.c.bf16 %v524_v23, %v523_v22  ;;  %v506_v25 = vld [vmem:[%s3293_s13 + $0x8] sm:$0xff]  ;;  %v507_v26 = vld [vmem:[%s3293_s13 + $0x10] sm:$0xff]  ;;  %v508_v27 = vld [vmem:[%s3293_s13 + $0x18] sm:$0xff]  ;;  %s2972_s27 = smov [#allocation14]  }
  0xc4   : > { %v2176_v28 = vld [vmem:[#allocation8] ss:$0 sm:$0xff]  ;;  %p2886_p12 = pnand %p2885_p7, %p3599_p4 }
  0xc5   : > { %2476 = vmatpush3.bf16.msra.mxu0 %v2473_v5  ;;  %v3338_v41 = vld [vmem:[%s3558_s6] sm:$0xff] }
  0xc6   : > { %2478 = vmatprep.subr.bf16.mxu0 %v2477_v8  ;;  %2379 = vmatprep.mubr.msk.f32.mxu1 %vm705_vm0, %v3338_v41  ;;  %v2177_v9 = vld [vmem:[%s3555_s3] ss:$0 sm:$0xff]  ;;  %p2887_p1 = pneg %p2886_p12 }
  0xc7   : > { %v2178_v14 = vld [vmem:[%s3556_s4] ss:$0 sm:$0xff] }
  0xc9   : > { %2480 = vmatpush3.bf16.msra.mxu0 %v2477_v8 }
  0xca   : > { %2482 = vmatprep.subr.bf16.mxu0 %v2481_v12 }
  0xcd   : > { %2484 = vmatpush3.bf16.msra.mxu0 %v2481_v12 }
  0xce   : > { %2486 = vmatprep.subr.bf16.mxu0 %v2485_v15 }
  0xd1   : > { %2488 = vmatpush3.bf16.msra.mxu0 %v2485_v15 }
  0xd2   : > { %2490 = vmatprep.subr.bf16.mxu0 %v2489_v18 }
  0xd5   : > { %2492 = vmatpush3.bf16.msra.mxu0 %v2489_v18 }
  0xd6   : > { %2494 = vmatprep.subr.bf16.mxu0 %v2493_v21 }
  0xd9   : > { %2496 = vmatpush3.bf16.msra.mxu0 %v2493_v21 }
  0xda   : > { %2498 = vmatprep.subr.bf16.mxu0 %v2497_v24 }
  0xdd   : > { %2500 = vmatpush3.bf16.msra.mxu0 %v2497_v24 }
  0xe0   : > { %2342 = vmatmul.mubr.f32.vlgmr.msra.gmra.mrb[0].mxu0 %v506_v25 }
  0xe1   : > { %2344 = vmatprep.mubr.f32.mxu0 %v507_v26  ;;  %v3357_v26 = vld [vmem:[%s3558_s6 + $0x8] sm:$0xff] }
  0xe4   : > { %2345 = vmatmul.mubr.f32.gmra.mrb[2].mxu0 %v508_v27 }
  0xe5   : > { %2351 = vmatprep.mubr.msk.f32.mxu0 %vm705_vm0, %v3338_v41 }
 0x1b3   : > { %v2343_v29 = vpop.f32.mrb[0].mxu0 }
 0x1b4   : > { %v598_v30 = vpop.f32.mrb[1].mxu0  ;;  %v3317_v32 = vadd.f32 %v2343_v29, %v2176_v28 }
 0x1b5   : > { %v3315_v31 = vadd.f32 %v2176_v28, %v598_v30 }
 0x1b6   : > { %v644_v36 = vmul.f32 %v3317_v32, %v3317_v32 }
 0x1b7   : > { %631 = vadd.xlane.f32.xlu0 %v3315_v31  ;;  %v643_v33 = vmul.f32 %v3315_v31, %v3315_v31  ;;  %v2346_v34 = vpop.f32.mrb[2].mxu0 }
 0x1b8   : > { %v608_v35 = vpop.f32.mrb[3].mxu0  ;;  %v3327_v38 = vadd.f32 %v2346_v34, %v2176_v28  ;;  %v704_v34 = vld [vmem:[#allocation9 + $0x8] sm:$0xff] }
 0x1b9   : > { %647 = vadd.xlane.f32.xlu1 %v643_v33  ;;  %v3325_v37 = vadd.f32 %v2176_v28, %v608_v35  ;;  %v3361_v33 = vld [vmem:[#allocation11] sm:$0xff]  ;;  %v703_v35 = vld [vmem:[#allocation9] sm:$0xff] }
 0x1ba   : > { %v646_v40 = vmul.f32 %v3327_v38, %v3327_v38 }
 0x1bb   : > { %633 = vadd.xlane.f32.xlu0 %v3317_v32  ;;  %v645_v39 = vmul.f32 %v3325_v37, %v3325_v37 }
 0x1bd   : > { %649 = vadd.xlane.f32.xlu1 %v644_v36 }
 0x1bf   : > { %635 = vadd.xlane.f32.xlu0 %v3325_v37 }
 0x1c1   : > { %637 = vadd.xlane.f32.xlu1 %v3327_v38 }
 0x1c3   : > { %651 = vadd.xlane.f32.xlu0 %v645_v39 }
 0x1c5   : > { %653 = vadd.xlane.f32.xlu1 %v646_v40 }
 0x244   : > { %v632_v42 = vpop.xlane.xlu0 %631 }
 0x245   : > { %v639_v43 = vmul.f32 0.03125, %v632_v42 }
 0x246   : > { %v648_v44 = vpop.xlane.xlu1 %647 }
 0x247   : > { %v659_v45 = vmul.f32 %v639_v43, %v639_v43  ;;  %v655_v46 = vmul.f32 0.03125, %v648_v44  ;;  %v667_v5 = vsub.f32 %v3315_v31, %v639_v43  ;;  %v3365_v44 = vld [vmem:[#allocation11 + $0x8] sm:$0xff] }
 0x248   : > { %v634_v47 = vpop.xlane.xlu0 %633 }
 0x249   : > { %v663_v48 = vsub.f32 %v655_v46, %v659_v45  ;;  %v640_v49 = vmul.f32 0.03125, %v634_v47 }
 0x24a   : > { %v650_v50 = vpop.xlane.xlu1 %649 }
 0x24b   : > { %v671_v51 = vadd.f32 1e-05, %v663_v48  ;;  %v660_v52 = vmul.f32 %v640_v49, %v640_v49  ;;  %v656_v53 = vmul.f32 0.03125, %v650_v50  ;;  %v668_v10 = vsub.f32 %v3317_v32, %v640_v49 }
 0x24c   : > { %v636_v54 = vpop.xlane.xlu0 %635 }
 0x24d   : > { %2682 = vrsqrt.f32 %v671_v51  ;;  %v664_v55 = vsub.f32 %v656_v53, %v660_v52  ;;  %v641_v56 = vmul.f32 0.03125, %v636_v54 }
 0x24e   : > { %v638_v57 = vpop.xlane.xlu1 %637 }
 0x24f   : > { %v672_v58 = vadd.f32 1e-05, %v664_v55  ;;  %v661_v59 = vmul.f32 %v641_v56, %v641_v56  ;;  %v642_v60 = vmul.f32 0.03125, %v638_v57  ;;  %v669_v16 = vsub.f32 %v3325_v37, %v641_v56 }
 0x250   : > { %v652_v61 = vpop.xlane.xlu0 %651 }
 0x251   : > { %2684 = vrsqrt.f32 %v672_v58  ;;  %v662_v62 = vmul.f32 %v642_v60, %v642_v60  ;;  %v657_v63 = vmul.f32 0.03125, %v652_v61  ;;  %v670_v19 = vsub.f32 %v3327_v38, %v642_v60 }
 0x252   : > { %v654_v0 = vpop.xlane.xlu1 %653 }
 0x253   : > { %v665_v1 = vsub.f32 %v657_v63, %v661_v59  ;;  %v658_v2 = vmul.f32 0.03125, %v654_v0 }
 0x255   : > { %v673_v3 = vadd.f32 1e-05, %v665_v1  ;;  %v666_v4 = vsub.f32 %v658_v2, %v662_v62 }
 0x257   : > { %v2683_v6 = vpop.eup %2682  ;;  %2686 = vrsqrt.f32 %v673_v3  ;;  %v674_v7 = vadd.f32 1e-05, %v666_v4 }
 0x258   : > { %v679_v8 = vmul.f32 %v2683_v6, %v667_v5 }
 0x259   : > { %2688 = vrsqrt.f32 %v674_v7  ;;  %v2189_v7 = vld [vmem:[%s3555_s3 + $0x1] ss:$0 sm:$0xff] }
 0x25a   : > { %v689_v13 = vmul.f32 %v2177_v9, %v679_v8 }
 0x25b   : > { %v2685_v11 = vpop.eup %2684 }
 0x25c   : > { %v680_v12 = vmul.f32 %v2685_v11, %v668_v10  ;;  %v699_v17 = vadd.f32 %v2178_v14, %v689_v13  ;;  %v2190_v10 = vld [vmem:[%s3556_s4 + $0x1] ss:$0 sm:$0xff] }
 0x25e   : > { %v690_v15 = vmul.f32 %v2177_v9, %v680_v12 }
 0x260   : > { %v700_v18 = vadd.f32 %v2178_v14, %v690_v15 }
 0x261   : > { %v2687_v20 = vpop.eup %2686 }
 0x262   : > { %v2501_v21 = vpack.c.bf16 %v700_v18, %v699_v17  ;;  %v681_v22 = vmul.f32 %v2687_v20, %v669_v16 }
 0x263   : > { %v2689_v23 = vpop.eup %2688 }
 0x264   : > { %2502 = vmatprep.subr.bf16.mxu0 %v2501_v21  ;;  %v682_v24 = vmul.f32 %v2689_v23, %v670_v19  ;;  %v691_v25 = vmul.f32 %v2177_v9, %v681_v22 }
 0x265   : > { %2504 = vmatpush3.bf16.msra.mxu0 %v2501_v21 }
 0x266   : > { %v692_v27 = vmul.f32 %v2177_v9, %v682_v24  ;;  %v701_v28 = vadd.f32 %v2178_v14, %v691_v25 }
 0x268   : > { %2352 = vmatmul.mubr.msk.f32.vlgmr.msra.gmra.mrb[4].mxu0 %vm705_vm0, %v3357_v26  ;;  %v702_v29 = vadd.f32 %v2178_v14, %v692_v27 }
 0x269   : > { %2358 = vmatprep.mubr.msk.f32.mxu0 %vm705_vm0, %v3361_v33 }
 0x26a   : > { %v2509_v30 = vpack.c.bf16 %v702_v29, %v701_v28 }
 0x33b   : > { %v2353_v36 = vpop.f32.mrb[4].mxu0 }
 0x33c   : > { %v788_v39 = vmul.f32 %v2353_v36, %v704_v34  ;;  %v778_v40 = vpop.f32.mrb[5].mxu0 }
 0x33d   : > { %v787_v42 = vmul.f32 %v778_v40, %v703_v35 }
 0x33f   : > { %v2505_v43 = vpack.c.bf16 %v788_v39, %v787_v42  ;;  %v1116_v42 = vld [vmem:[#allocation9 + $0x18] sm:$0xff] }
 0x341   : > { %2506 = vmatprep.subr.bf16.mxu0 %v2505_v43 }
 0x342   : > { %2508 = vmatpush3.bf16.msra.mxu0 %v2505_v43 }
 0x343   : > { %2510 = vmatprep.subr.bf16.mxu0 %v2509_v30 }
 0x345   : > { %2359 = vmatmul.mubr.msk.f32.vlgmr.msra.gmra.mrb[6].mxu0 %vm705_vm0, %v3365_v44 }
 0x346   : > { %2512 = vmatpush3.bf16.msra.mxu0 %v2509_v30  ;;  %2365 = vmatprep.mubr.msk.f32.mxu0 %vm705_vm0, %v3338_v41 }
 0x349   : > { %2366 = vmatmul.mubr.msk.f32.vlgmr.msra.gmra.mrb[8].mxu0 %vm705_vm0, %v3357_v26 }
 0x34a   : > { %2372 = vmatprep.mubr.msk.f32.mxu0 %vm705_vm0, %v3361_v33 }
 0x418   : > { %v2360_v45 = vpop.f32.mrb[6].mxu0 }
 0x419   : > { %v3376_v46 = vadd.f32 %v2360_v45, %v3317_v32  ;;  %v861_v47 = vpop.f32.mrb[7].mxu0  ;;  %v1115_v45 = vld [vmem:[#allocation9 + $0x10] sm:$0xff] }
 0x41a   : > { %v3379_v48 = vadd.f32 %v861_v47, %v3315_v31 }
 0x41b   : > { %1044 = vadd.xlane.f32.xlu1 %v3376_v46  ;;  %v1055_v52 = vmul.f32 %v3376_v46, %v3376_v46 }
 0x41c   : > { %1042 = vadd.xlane.f32.xlu0 %v3379_v48  ;;  %v2367_v49 = vpop.f32.mrb[8].mxu0  ;;  %v1054_v54 = vmul.f32 %v3379_v48, %v3379_v48 }
 0x41d   : > { %v952_v50 = vmul.f32 %v2367_v49, %v704_v34  ;;  %v942_v51 = vpop.f32.mrb[9].mxu0 }
 0x41e   : > { %v951_v53 = vmul.f32 %v942_v51, %v703_v35 }
 0x41f   : > { %1060 = vadd.xlane.f32.xlu1 %v1055_v52 }
 0x420   : > { %v2513_v32 = vpack.c.bf16 %v952_v50, %v951_v53  ;;  %1058 = vadd.xlane.f32.xlu0 %v1054_v54 }
 0x422   : > { %2514 = vmatprep.subr.bf16.mxu0 %v2513_v32 }
 0x423   : > { %2516 = vmatpush3.bf16.msra.mxu0 %v2513_v32 }
 0x426   : > { %2373 = vmatmul.mubr.msk.f32.vlgmr.msra.gmra.mrb[10].mxu0 %vm705_vm0, %v3365_v44 }
 0x427   : > { %2414 = vmatprep.mubr.msk.f32.mxu0 %vm705_vm0, %v3361_v33 }
 0x4a8   : > { %v1045_v31 = vpop.xlane.xlu1 %1044 }
 0x4a9   : > { %v1051_v55 = vmul.f32 0.03125, %v1045_v31  ;;  %v1043_v56 = vpop.xlane.xlu0 %1042 }
 0x4aa   : > { %v1050_v57 = vmul.f32 0.03125, %v1043_v56 }
 0x4ab   : > { %v1071_v59 = vmul.f32 %v1051_v55, %v1051_v55  ;;  %v1079_v4 = vsub.f32 %v3376_v46, %v1051_v55 }
 0x4ac   : > { %v1061_v58 = vpop.xlane.xlu1 %1060  ;;  %v1070_v62 = vmul.f32 %v1050_v57, %v1050_v57  ;;  %v1078_v6 = vsub.f32 %v3379_v48, %v1050_v57 }
 0x4ad   : > { %v1067_v60 = vmul.f32 0.03125, %v1061_v58  ;;  %v1059_v61 = vpop.xlane.xlu0 %1058 }
 0x4ae   : > { %v1066_v63 = vmul.f32 0.03125, %v1059_v61 }
 0x4af   : > { %v1075_v0 = vsub.f32 %v1067_v60, %v1071_v59 }
 0x4b0   : > { %v1074_v1 = vsub.f32 %v1066_v63, %v1070_v62 }
 0x4b1   : > { %v1083_v2 = vadd.f32 1e-05, %v1075_v0 }
 0x4b2   : > { %v1082_v3 = vadd.f32 1e-05, %v1074_v1 }
 0x4b3   : > { %2690 = vrsqrt.f32 %v1083_v2 }
 0x4b4   : > { %2692 = vrsqrt.f32 %v1082_v3 }
 0x4bd   : > { %v2691_v5 = vpop.eup %2690 }
 0x4be   : > { %v2693_v8 = vpop.eup %2692  ;;  %v1091_v9 = vmul.f32 %v2691_v5, %v1079_v4 }
 0x4bf   : > { %v1090_v11 = vmul.f32 %v2693_v8, %v1078_v6 }
 0x4c0   : > { %v1101_v12 = vmul.f32 %v2189_v7, %v1091_v9 }
 0x4c1   : > { %v1100_v13 = vmul.f32 %v2189_v7, %v1090_v11 }
 0x4c2   : > { %v1111_v14 = vadd.f32 %v2190_v10, %v1101_v12 }
 0x4c3   : > { %v1110_v15 = vadd.f32 %v2190_v10, %v1100_v13 }
 0x4c5   : > { %v2517_v16 = vpack.c.bf16 %v1111_v14, %v1110_v15 }
 0x4c7   : > { %2518 = vmatprep.subr.bf16.mxu1 %v2517_v16 }
 0x4c8   : > { %2520 = vmatpush3.bf16.msra.mxu1 %v2517_v16 }
 0x4cb   : > { %2380 = vmatmul.mubr.msk.f32.vlgmr.msra.gmra.mrb[0].mxu1 %vm705_vm0, %v3357_v26 }
 0x4cc   : > { %2386 = vmatprep.mubr.msk.f32.mxu1 %vm705_vm0, %v3361_v33 }
 0x4f9   : > { %v2374_v17 = vpop.f32.mrb[10].mxu0 }
 0x4fa   : > { %v3404_v18 = vadd.f32 %v2374_v17, %v3327_v38  ;;  %v1019_v19 = vpop.f32.mrb[11].mxu0 }
 0x4fb   : > { %v3407_v20 = vadd.f32 %v1019_v19, %v3325_v37 }
 0x4fc   : > { %1048 = vadd.xlane.f32.xlu1 %v3404_v18  ;;  %v1057_v21 = vmul.f32 %v3404_v18, %v3404_v18 }
 0x4fd   : > { %1046 = vadd.xlane.f32.xlu0 %v3407_v20  ;;  %v1056_v22 = vmul.f32 %v3407_v20, %v3407_v20 }
 0x500   : > { %1064 = vadd.xlane.f32.xlu1 %v1057_v21 }
 0x501   : > { %1062 = vadd.xlane.f32.xlu0 %v1056_v22 }
 0x589   : > { %v1049_v23 = vpop.xlane.xlu1 %1048 }
 0x58a   : > { %v1053_v24 = vmul.f32 0.03125, %v1049_v23  ;;  %v1047_v38 = vpop.xlane.xlu0 %1046 }
 0x58b   : > { %v1052_v25 = vmul.f32 0.03125, %v1047_v38  ;;  %v2201_v38 = vld [vmem:[%s3555_s3 + $0x2] ss:$0 sm:$0xff] }
 0x58c   : > { %v1073_v28 = vmul.f32 %v1053_v24, %v1053_v24  ;;  %v1081_v43 = vsub.f32 %v3404_v18, %v1053_v24 }
 0x58d   : > { %v1065_v27 = vpop.xlane.xlu1 %1064  ;;  %v1072_v30 = vmul.f32 %v1052_v25, %v1052_v25  ;;  %v1080_v49 = vsub.f32 %v3407_v20, %v1052_v25 }
 0x58e   : > { %v1069_v37 = vmul.f32 0.03125, %v1065_v27  ;;  %v1063_v29 = vpop.xlane.xlu0 %1062 }
 0x58f   : > { %v1068_v34 = vmul.f32 0.03125, %v1063_v29 }
 0x590   : > { %v1077_v35 = vsub.f32 %v1069_v37, %v1073_v28  ;;  %v2202_v28 = vld [vmem:[%s3556_s4 + $0x2] ss:$0 sm:$0xff] }
 0x591   : > { %v1076_v36 = vsub.f32 %v1068_v34, %v1072_v30 }
 0x592   : > { %v1085_v39 = vadd.f32 1e-05, %v1077_v35 }
 0x593   : > { %v1084_v40 = vadd.f32 1e-05, %v1076_v36 }
 0x594   : > { %2694 = vrsqrt.f32 %v1085_v39 }
 0x595   : > { %2696 = vrsqrt.f32 %v1084_v40 }
 0x59e   : > { %v2695_v47 = vpop.eup %2694  ;;  %v2381_v50 = vpop.f32.mrb[0].mxu1 }
 0x59f   : > { %v2697_v51 = vpop.eup %2696  ;;  %v1193_v52 = vmul.f32 %v2381_v50, %v1116_v42  ;;  %v1183_v53 = vpop.f32.mrb[1].mxu1  ;;  %v1093_v54 = vmul.f32 %v2695_v47, %v1081_v43 }
 0x5a0   : > { %v1192_v32 = vmul.f32 %v1183_v53, %v1115_v45  ;;  %v1092_v31 = vmul.f32 %v2697_v51, %v1080_v49 }
 0x5a1   : > { %v1103_v55 = vmul.f32 %v2189_v7, %v1093_v54 }
 0x5a2   : > { %v2521_v56 = vpack.c.bf16 %v1193_v52, %v1192_v32  ;;  %v1102_v57 = vmul.f32 %v2189_v7, %v1092_v31 }
 0x5a3   : > { %v1113_v58 = vadd.f32 %v2190_v10, %v1103_v55 }
 0x5a4   : > { %2522 = vmatprep.subr.bf16.mxu1 %v2521_v56  ;;  %v1112_v59 = vadd.f32 %v2190_v10, %v1102_v57 }
 0x5a5   : > { %2524 = vmatpush3.bf16.msra.mxu1 %v2521_v56 }
 0x5a6   : > { %v2525_v60 = vpack.c.bf16 %v1113_v58, %v1112_v59  ;;  %v1515_v58 = vld [vmem:[#allocation9 + $0x28] sm:$0xff] }
 0x5a8   : > { %2387 = vmatmul.mubr.msk.f32.vlgmr.msra.gmra.mrb[2].mxu1 %vm705_vm0, %v3365_v44  ;;  %2526 = vmatprep.subr.bf16.mxu1 %v2525_v60 }
 0x5a9   : > { %2528 = vmatpush3.bf16.msra.mxu1 %v2525_v60  ;;  %2393 = vmatprep.mubr.msk.f32.mxu1 %vm705_vm0, %v3338_v41  ;;  %v1514_v60 = vld [vmem:[#allocation9 + $0x20] sm:$0xff] }
 0x5ac   : > { %2394 = vmatmul.mubr.msk.f32.vlgmr.msra.gmra.mrb[4].mxu1 %vm705_vm0, %v3357_v26 }
 0x5ad   : > { %2400 = vmatprep.mubr.msk.f32.mxu1 %vm705_vm0, %v3361_v33 }
 0x67b   : > { %v2388_v61 = vpop.f32.mrb[2].mxu1 }
 0x67c   : > { %v3426_v62 = vadd.f32 %v2388_v61, %v3376_v46  ;;  %v1260_v63 = vpop.f32.mrb[3].mxu1 }
 0x67d   : > { %v3429_v0 = vadd.f32 %v1260_v63, %v3379_v48 }
 0x67e   : > { %1443 = vadd.xlane.f32.xlu1 %v3426_v62  ;;  %v1454_v4 = vmul.f32 %v3426_v62, %v3426_v62 }
 0x67f   : > { %1441 = vadd.xlane.f32.xlu0 %v3429_v0  ;;  %v2395_v1 = vpop.f32.mrb[4].mxu1  ;;  %v1453_v6 = vmul.f32 %v3429_v0, %v3429_v0 }
 0x680   : > { %v1351_v2 = vmul.f32 %v2395_v1, %v1116_v42  ;;  %v1341_v3 = vpop.f32.mrb[5].mxu1 }
 0x681   : > { %v1350_v5 = vmul.f32 %v1341_v3, %v1115_v45 }
 0x682   : > { %1459 = vadd.xlane.f32.xlu1 %v1454_v4 }
 0x683   : > { %v2529_v46 = vpack.c.bf16 %v1351_v2, %v1350_v5  ;;  %1457 = vadd.xlane.f32.xlu0 %v1453_v6 }
 0x685   : > { %2530 = vmatprep.subr.bf16.mxu1 %v2529_v46 }
 0x686   : > { %2532 = vmatpush3.bf16.msra.mxu1 %v2529_v46 }
 0x689   : > { %2401 = vmatmul.mubr.msk.f32.vlgmr.msra.gmra.mrb[6].mxu1 %vm705_vm0, %v3365_v44 }
 0x68a   : > { %2407 = vmatprep.mubr.msk.f32.mxu1 %vm705_vm0, %v3338_v41 }
 0x70b   : > { %v1444_v48 = vpop.xlane.xlu1 %1443 }
 0x70c   : > { %v1450_v7 = vmul.f32 0.03125, %v1444_v48  ;;  %v1442_v8 = vpop.xlane.xlu0 %1441 }
 0x70d   : > { %v1449_v9 = vmul.f32 0.03125, %v1442_v8 }
 0x70e   : > { %v1470_v11 = vmul.f32 %v1450_v7, %v1450_v7  ;;  %v1478_v22 = vsub.f32 %v3426_v62, %v1450_v7 }
 0x70f   : > { %v1460_v10 = vpop.xlane.xlu1 %1459  ;;  %v1469_v14 = vmul.f32 %v1449_v9, %v1449_v9  ;;  %v1477_v24 = vsub.f32 %v3429_v0, %v1449_v9 }
 0x710   : > { %v1466_v12 = vmul.f32 0.03125, %v1460_v10  ;;  %v1458_v13 = vpop.xlane.xlu0 %1457 }
 0x711   : > { %v1465_v15 = vmul.f32 0.03125, %v1458_v13  ;;  %v1911_v13 = vld [vmem:[#allocation12 + $0x8] sm:$0xff] }
 0x712   : > { %v1474_v16 = vsub.f32 %v1466_v12, %v1470_v11  ;;  %v1910_v12 = vld [vmem:[#allocation12] sm:$0xff] }
 0x713   : > { %v1473_v17 = vsub.f32 %v1465_v15, %v1469_v14  ;;  %v2549_v14 = vpack.c.bf16 %v1911_v13, %v1910_v12 }
 0x714   : > { %v1482_v19 = vadd.f32 1e-05, %v1474_v16 }
 0x715   : > { %v1481_v21 = vadd.f32 1e-05, %v1473_v17 }
 0x716   : > { %2698 = vrsqrt.f32 %v1482_v19 }
 0x717   : > { %2700 = vrsqrt.f32 %v1481_v21 }
 0x720   : > { %v2699_v23 = vpop.eup %2698 }
 0x721   : > { %v2701_v25 = vpop.eup %2700  ;;  %v1490_v27 = vmul.f32 %v2699_v23, %v1478_v22 }
 0x722   : > { %v1489_v37 = vmul.f32 %v2701_v25, %v1477_v24 }
 0x723   : > { %v1500_v29 = vmul.f32 %v2201_v38, %v1490_v27  ;;  %v1914_v27 = vld [vmem:[#allocation12 + $0x20] sm:$0xff] }
 0x724   : > { %v1499_v30 = vmul.f32 %v2201_v38, %v1489_v37 }
 0x725   : > { %v1510_v34 = vadd.f32 %v2202_v28, %v1500_v29  ;;  %v1916_v29 = vld [vmem:[#allocation12 + $0x30] sm:$0xff] }
 0x726   : > { %v1509_v35 = vadd.f32 %v2202_v28, %v1499_v30  ;;  %v1917_v30 = vld [vmem:[#allocation12 + $0x38] sm:$0xff] }
 0x728   : > { %v2533_v36 = vpack.c.bf16 %v1510_v34, %v1509_v35  ;;  %v2561_v34 = vpack.c.bf16 %v1917_v30, %v1916_v29  ;;  %v1918_v35 = vld [vmem:[#allocation12 + $0x40] sm:$0xff] }
 0x72a   : > { %2534 = vmatprep.subr.bf16.mxu1 %v2533_v36 }
 0x72b   : > { %2536 = vmatpush3.bf16.msra.mxu1 %v2533_v36  ;;  %v1919_v36 = vld [vmem:[#allocation12 + $0x48] sm:$0xff] }
 0x72e   : > { %2408 = vmatmul.mubr.msk.f32.vlgmr.msra.gmra.mrb[8].mxu1 %vm705_vm0, %v3357_v26 }
 0x72f   : > { %2421 = vmatprep.mubr.msk.f32.mxu1 %vm705_vm0, %v3338_v41 }
 0x75c   : > { %v2402_v39 = vpop.f32.mrb[6].mxu1 }
 0x75d   : > { %v3454_v40 = vadd.f32 %v2402_v39, %v3404_v18  ;;  %v1418_v42 = vpop.f32.mrb[7].mxu1  ;;  %v2565_v39 = vpack.c.bf16 %v1919_v36, %v1918_v35 }
 0x75e   : > { %v3457_v43 = vadd.f32 %v1418_v42, %v3407_v20  ;;  %v1920_v42 = vld [vmem:[#allocation12 + $0x50] sm:$0xff] }
 0x75f   : > { %1447 = vadd.xlane.f32.xlu1 %v3454_v40  ;;  %v1456_v45 = vmul.f32 %v3454_v40, %v3454_v40 }
 0x760   : > { %1445 = vadd.xlane.f32.xlu0 %v3457_v43  ;;  %v1455_v47 = vmul.f32 %v3457_v43, %v3457_v43 }
 0x763   : > { %1463 = vadd.xlane.f32.xlu1 %v1456_v45 }
 0x764   : > { %1461 = vadd.xlane.f32.xlu0 %v1455_v47  ;;  %v1922_v47 = vld [vmem:[#allocation12 + $0x60] sm:$0xff] }
 0x7ec   : > { %v1448_v41 = vpop.xlane.xlu1 %1447 }
 0x7ed   : > { %v1452_v49 = vmul.f32 0.03125, %v1448_v41  ;;  %v1446_v18 = vpop.xlane.xlu0 %1445  ;;  %v1923_v41 = vld [vmem:[#allocation12 + $0x68] sm:$0xff] }
 0x7ee   : > { %v1451_v50 = vmul.f32 0.03125, %v1446_v18  ;;  %v1924_v18 = vld [vmem:[#allocation12 + $0x70] sm:$0xff] }
 0x7ef   : > { %v1472_v52 = vmul.f32 %v1452_v49, %v1452_v49  ;;  %v1480_v59 = vsub.f32 %v3454_v40, %v1452_v49  ;;  %v2573_v49 = vpack.c.bf16 %v1923_v41, %v1922_v47 }
 0x7f0   : > { %v1464_v51 = vpop.xlane.xlu1 %1463  ;;  %v1471_v54 = vmul.f32 %v1451_v50, %v1451_v50  ;;  %v1479_v63 = vsub.f32 %v3457_v43, %v1451_v50  ;;  %v1925_v50 = vld [vmem:[#allocation12 + $0x78] sm:$0xff] }
 0x7f1   : > { %v1468_v20 = vmul.f32 0.03125, %v1464_v51  ;;  %v1462_v53 = vpop.xlane.xlu0 %1461  ;;  %v2577_v51 = vpack.c.bf16 %v1925_v50, %v1924_v18 }
 0x7f2   : > { %v1467_v32 = vmul.f32 0.03125, %v1462_v53 }
 0x7f3   : > { %v1476_v31 = vsub.f32 %v1468_v20, %v1472_v52 }
 0x7f4   : > { %v1475_v55 = vsub.f32 %v1467_v32, %v1471_v54 }
 0x7f5   : > { %v1484_v56 = vadd.f32 1e-05, %v1476_v31 }
 0x7f6   : > { %v1483_v57 = vadd.f32 1e-05, %v1475_v55 }
 0x7f7   : > { %2702 = vrsqrt.f32 %v1484_v56 }
 0x7f8   : > { %2704 = vrsqrt.f32 %v1483_v57 }
 0x801   : > { %v2703_v61 = vpop.eup %2702  ;;  %v2409_v1 = vpop.f32.mrb[8].mxu1 }
 0x802   : > { %v2705_v2 = vpop.eup %2704  ;;  %v1592_v3 = vmul.f32 %v2409_v1, %v1515_v58  ;;  %v1582_v4 = vpop.f32.mrb[9].mxu1  ;;  %v1492_v5 = vmul.f32 %v2703_v61, %v1480_v59 }
 0x803   : > { %v1591_v6 = vmul.f32 %v1582_v4, %v1514_v60  ;;  %v1491_v46 = vmul.f32 %v2705_v2, %v1479_v63  ;;  %v2211_v4 = vld [vmem:[%s3595_s26] ss:$0 sm:$0xff]  ;;  %s3508_s26 = scalar_lea.hbm %s3598_s19, %s2220_s14 }
 0x804   : > { %v1502_v48 = vmul.f32 %v2201_v38, %v1492_v5 }
 0x805   : > { %v2537_v7 = vpack.c.bf16 %v1592_v3, %v1591_v6  ;;  %v1501_v8 = vmul.f32 %v2201_v38, %v1491_v46  ;;  %v1913_v38 = vld [vmem:[#allocation12 + $0x18] sm:$0xff] }
 0x806   : > { %v1512_v9 = vadd.f32 %v2202_v28, %v1502_v48  ;;  %v2212_v48 = vld [vmem:[%s3596_s1] ss:$0 sm:$0xff]  ;;  %s2888_s1 = sshll.u32 %s2972_s27, 4  ;;  %s2889_s1 = int_to_ptr.vmem [resolvable:$false] %s2888_s1 }
 0x807   : > { %2538 = vmatprep.subr.bf16.mxu0 %v2537_v7  ;;  %v1511_v10 = vadd.f32 %v2202_v28, %v1501_v8  ;;  %v1915_v28 = vld [vmem:[#allocation12 + $0x28] sm:$0xff]  ;;  %s2890_s16 = scalar_lea.vmem %s2889_s1, 1024  ;;  %p2891_p13 = scmp.lt.s32.totalorder %s3503_s9, %s2889_s1 }
 0x808   : > { %2540 = vmatpush3.bf16.msra.mxu0 %v2537_v7  ;;  %v2557_v37 = vpack.c.bf16 %v1915_v28, %v1914_v27  ;;  %v2213_v27 = vld [vmem:[%s3597_s28] ss:$0 sm:$0xff]  ;;  %p2892_p0 = scmp.lt.s32.totalorder %s2890_s16, %s2884_s12 }
 0x809   : > { %v2541_v11 = vpack.c.bf16 %v1512_v9, %v1511_v10 }
 0x80a   : > { %p2893_p2 = por %p2892_p0, %p2891_p13 }
 0x80b   : > { %2415 = vmatmul.mubr.msk.f32.vlgmr.msra.gmra.mrb[12].mxu0 %vm705_vm0, %v3365_v44  ;;  %2542 = vmatprep.subr.bf16.mxu1 %v2541_v11 }
 0x80c   : > { %2544 = vmatpush3.bf16.msra.mxu1 %v2541_v11  ;;  %2428 = vmatprep.mubr.msk.f32.mxu0 %vm705_vm0, %v3361_v33  ;;  %p2894_p8 = pnand %p2893_p2, %p2887_p1 }
 0x80d   : > { %2550 = vmatprep.subr.bf16.mxu1 %v2549_v14 }
 0x80f   : > { %2422 = vmatmul.mubr.msk.f32.vlgmr.msra.gmra.mrb[10].mxu1 %vm705_vm0, %v3357_v26 }
 0x810   : > { %2552 = vmatpush3.bf16.msra.mxu1 %v2549_v14 }
 0x8de   : > { %v2416_v15 = vpop.f32.mrb[12].mxu0 }
 0x8df   : > { %v3474_v16 = vadd.f32 %v2416_v15, %v3426_v62  ;;  %v1659_v17 = vpop.f32.mrb[13].mxu0 }
 0x8e0   : > { %v3477_v19 = vadd.f32 %v1659_v17, %v3429_v0  ;;  %v1912_v0 = vld [vmem:[#allocation12 + $0x10] sm:$0xff] }
 0x8e1   : > { %1840 = vadd.xlane.f32.xlu1 %v3474_v16  ;;  %v1851_v22 = vmul.f32 %v3474_v16, %v3474_v16  ;;  %v2553_v25 = vpack.c.bf16 %v1913_v38, %v1912_v0 }
 0x8e2   : > { %1838 = vadd.xlane.f32.xlu0 %v3477_v19  ;;  %v2423_v33 = vpop.f32.mrb[10].mxu1  ;;  %v1850_v24 = vmul.f32 %v3477_v19, %v3477_v19 }
 0x8e3   : > { %v1750_v21 = vmul.f32 %v2423_v33, %v1515_v58  ;;  %v1740_v26 = vpop.f32.mrb[11].mxu1  ;;  %2554 = vmatprep.subr.bf16.mxu1 %v2553_v25 }
 0x8e4   : > { %v1749_v23 = vmul.f32 %v1740_v26, %v1514_v60  ;;  %2556 = vmatpush3.bf16.msra.mxu1 %v2553_v25 }
 0x8e5   : > { %1856 = vadd.xlane.f32.xlu1 %v1851_v22  ;;  %2558 = vmatprep.subr.bf16.mxu1 %v2557_v37 }
 0x8e6   : > { %v2545_v62 = vpack.c.bf16 %v1750_v21, %v1749_v23  ;;  %1854 = vadd.xlane.f32.xlu0 %v1850_v24 }
 0x8e8   : > { %2546 = vmatprep.subr.bf16.mxu0 %v2545_v62  ;;  %2560 = vmatpush3.bf16.msra.mxu1 %v2557_v37 }
 0x8e9   : > { %2548 = vmatpush3.bf16.msra.mxu0 %v2545_v62  ;;  %2562 = vmatprep.subr.bf16.mxu1 %v2561_v34 }
 0x8ec   : > { %2429 = vmatmul.mubr.msk.f32.vlgmr.msra.gmra.mrb[14].mxu0 %vm705_vm0, %v3365_v44  ;;  %2564 = vmatpush3.bf16.msra.mxu1 %v2561_v34  ;;  %v1921_v44 = vld [vmem:[#allocation12 + $0x58] sm:$0xff] }
 0x8ed   : > { %v2569_v45 = vpack.c.bf16 %v1921_v44, %v1920_v42  ;;  %2566 = vmatprep.subr.bf16.mxu1 %v2565_v39 }
 0x8f0   : > { %2568 = vmatpush3.bf16.msra.mxu1 %v2565_v39 }
 0x8f1   : > { %2570 = vmatprep.subr.bf16.mxu1 %v2569_v45 }
 0x8f4   : > { %2572 = vmatpush3.bf16.msra.mxu1 %v2569_v45 }
 0x8f5   : > { %2574 = vmatprep.subr.bf16.mxu1 %v2573_v49 }
 0x8f8   : > { %2576 = vmatpush3.bf16.msra.mxu1 %v2573_v49 }
 0x8f9   : > { %2578 = vmatprep.subr.bf16.mxu1 %v2577_v51 }
 0x8fc   : > { %2580 = vmatpush3.bf16.msra.mxu1 %v2577_v51 }
 0x96e   : > { %v1841_v52 = vpop.xlane.xlu1 %1840 }
 0x96f   : > { %v1847_v20 = vmul.f32 0.03125, %v1841_v52  ;;  %v1839_v53 = vpop.xlane.xlu0 %1838 }
 0x970   : > { %v1846_v54 = vmul.f32 0.03125, %v1839_v53 }
 0x971   : > { %v1867_v31 = vmul.f32 %v1847_v20, %v1847_v20  ;;  %v1875_v1 = vsub.f32 %v3474_v16, %v1847_v20 }
 0x972   : > { %v1857_v32 = vpop.xlane.xlu1 %1856  ;;  %v1866_v57 = vmul.f32 %v1846_v54, %v1846_v54  ;;  %v1874_v3 = vsub.f32 %v3477_v19, %v1846_v54 }
 0x973   : > { %v1863_v55 = vmul.f32 0.03125, %v1857_v32  ;;  %v1855_v56 = vpop.xlane.xlu0 %1854 }
 0x974   : > { %v1862_v58 = vmul.f32 0.03125, %v1855_v56 }
 0x975   : > { %v1871_v59 = vsub.f32 %v1863_v55, %v1867_v31 }
 0x976   : > { %v1870_v60 = vsub.f32 %v1862_v58, %v1866_v57 }
 0x977   : > { %v1879_v61 = vadd.f32 1e-05, %v1871_v59 }
 0x978   : > { %v1878_v63 = vadd.f32 1e-05, %v1870_v60 }
 0x979   : > { %2706 = vrsqrt.f32 %v1879_v61 }
 0x97a   : > { %2708 = vrsqrt.f32 %v1878_v63 }
 0x983   : > { %v2707_v2 = vpop.eup %2706 }
 0x984   : > { %v2709_v5 = vpop.eup %2708  ;;  %v1887_v6 = vmul.f32 %v2707_v2, %v1875_v1 }
 0x985   : > { %v1886_v46 = vmul.f32 %v2709_v5, %v1874_v3 }
 0x986   : > { %v1897_v7 = vmul.f32 %v2211_v4, %v1887_v6 }
 0x987   : > { %v1896_v8 = vmul.f32 %v2211_v4, %v1886_v46 }
 0x988   : > { %v1907_v10 = vadd.f32 %v2212_v48, %v1897_v7 }
 0x989   : > { %v1906_v9 = vadd.f32 %v2212_v48, %v1896_v8 }
 0x98b   : > { %2463 = vmatprep.mubr.f32.mxu1 %v1906_v9 }
 0x98c   : > { %2464 = vmatmul.mubr.f32.vlgmr.msra.gmra.mrb[12].mxu1 %v1907_v10 }
 0x9bf   : > { %v2430_v11 = vpop.f32.mrb[14].mxu0 }
 0x9c0   : > { %v1829_v12 = vadd.f32 %v2430_v11, %v3454_v40  ;;  %v1817_v13 = vpop.f32.mrb[15].mxu0 }
 0x9c1   : > { %v1828_v14 = vadd.f32 %v1817_v13, %v3457_v43 }
 0x9c2   : > { %1844 = vadd.xlane.f32.xlu1 %v1829_v12  ;;  %v1853_v15 = vmul.f32 %v1829_v12, %v1829_v12 }
 0x9c3   : > { %1842 = vadd.xlane.f32.xlu0 %v1828_v14  ;;  %v1852_v16 = vmul.f32 %v1828_v14, %v1828_v14 }
 0x9c6   : > { %1860 = vadd.xlane.f32.xlu1 %v1853_v15 }
 0x9c7   : > { %1858 = vadd.xlane.f32.xlu0 %v1852_v16 }
 0xa4f   : > { %v1845_v17 = vpop.xlane.xlu1 %1844 }
 0xa50   : > { %v1849_v19 = vmul.f32 0.03125, %v1845_v17  ;;  %v1843_v33 = vpop.xlane.xlu0 %1842 }
 0xa51   : > { %v1848_v21 = vmul.f32 0.03125, %v1843_v33 }
 0xa52   : > { %v1869_v22 = vmul.f32 %v1849_v19, %v1849_v19  ;;  %v1877_v34 = vsub.f32 %v1829_v12, %v1849_v19 }
 0xa53   : > { %v1861_v26 = vpop.xlane.xlu1 %1860  ;;  %v1868_v62 = vmul.f32 %v1848_v21, %v1848_v21  ;;  %v1876_v36 = vsub.f32 %v1828_v14, %v1848_v21 }
 0xa54   : > { %v1865_v23 = vmul.f32 0.03125, %v1861_v26  ;;  %v1859_v24 = vpop.xlane.xlu0 %1858 }
 0xa55   : > { %v1864_v40 = vmul.f32 0.03125, %v1859_v24 }
 0xa56   : > { %v1873_v0 = vsub.f32 %v1865_v23, %v1869_v22 }
 0xa57   : > { %v1872_v38 = vsub.f32 %v1864_v40, %v1868_v62 }
 0xa58   : > { %v1881_v43 = vadd.f32 1e-05, %v1873_v0 }
 0xa59   : > { %v1880_v25 = vadd.f32 1e-05, %v1872_v38 }
 0xa5a   : > { %2710 = vrsqrt.f32 %v1881_v43 }
 0xa5b   : > { %2712 = vrsqrt.f32 %v1880_v25 }
 0xa5f   : > { %v2465_v28 = vpop.f32.mrb[12].mxu1 }
 0xa60   : > { %v2005_v37 = vadd.f32 %v2465_v28, %v2213_v27  ;;  %v1999_v29 = vpop.f32.mrb[13].mxu1 }
 0xa61   : > { %v2000_v30 = vadd.f32 %v2213_v27, %v1999_v29 }
 0xa62   : > { %2019 = vst [vmem:[%s502_s18 + $0x8] sm:$0xff] %v2005_v37 }
 0xa63   : > { %2018 = vst [vmem:[%s502_s18] sm:$0xff] %v2000_v30 }
 0xa64   : > { %v2711_v35 = vpop.eup %2710 }
 0xa65   : > { %v2713_v39 = vpop.eup %2712  ;;  %v1889_v42 = vmul.f32 %v2711_v35, %v1877_v34 }
 0xa66   : > { %v1888_v44 = vmul.f32 %v2713_v39, %v1876_v36 }
 0xa67   : > { %v1899_v45 = vmul.f32 %v2211_v4, %v1889_v42 }
 0xa68   : > { %v1898_v47 = vmul.f32 %v2211_v4, %v1888_v44 }
 0xa69   : > { %v1909_v49 = vadd.f32 %v2212_v48, %v1899_v45 }
 0xa6a   : > { %v1908_v41 = vadd.f32 %v2212_v48, %v1898_v47 }
 0xa6c   : > { %2466 = vmatprep.mubr.f32.mxu1 %v1908_v41 }
 0xa6d   : > { %2467 = vmatmul.mubr.f32.gmra.mrb[14].mxu1 %v1909_v49 }
 0xb40   : > { %v2468_v18 = vpop.f32.mrb[14].mxu1 }
 0xb41   : > { %v2015_v50 = vadd.f32 %v2468_v18, %v2213_v27  ;;  %v2009_v51 = vpop.f32.mrb[15].mxu1 }
 0xb42   : > { %v2010_v52 = vadd.f32 %v2213_v27, %v2009_v51 }
 0xb43   : > { %2021 = vst [vmem:[%s502_s18 + $0x18] sm:$0xff] %v2015_v50 }
 0xb44   : > { %2020 = vst [vmem:[%s502_s18 + $0x10] sm:$0xff] %v2010_v52 }
 0xb45   : > { %2897 = shalt.err (!%p2894_p8)
}
 0xb46   : > { %s2898_s13 = scalar_lea.hbm %s3508_s26, 512  ;;  %s2902_s14 = scalar_lea.hbm %s3598_s19, 1024 }
 0xb47   : > { %p2899_p6 = scmp.ne.s32.totalorder %s3508_s26, %s2898_s13  ;;  %p2903_p3 = scmp.lt.u32.totalorder %s3508_s26, %s3598_s19 }
 0xb48   : > { %p2904_p5 = scmp.lt.u32.totalorder %s2902_s14, %s2898_s13  ;;  %p2906_p7 = scmp.lt.u32.totalorder %s2898_s13, %s3508_s26 }
 0xb49   : > { %p2900_p10 = pnand %p2899_p6, %p3599_p4 }
 0xb4a   : > { %p2905_p9 = por %p2904_p5, %p2903_p3 }
 0xb4b   : > { %p2901_p11 = pneg %p2900_p10 }
 0xb4c   : > { %p2907_p12 = por %p2906_p7, %p2905_p9 }
 0xb4e   : > { %p2908_p1 = pnand %p2907_p12, %p2901_p11 }
 0xb50   : > { %2911 = shalt.err (!%p2908_p1)
}
 0xb51   : > { %s2973_s12 = smov 128   ;;  %s2974_s27 = smov 8  }
 0xb52   : > { %2603 = dma.vmem_to_hbm [thread:$0]  (%p3599_p4), %s3503_s9, 512, %s3508_s26, %s2023_s8, %s2973_s12, %s2973_s12, %s2974_s27  }
 0xb53 PF: > { %s2051_s1 = sand.u32 1, %s2950_s21   ;;  %p3600_p13 = scmp.ne.s32.totalorder %s3585_s30, 0 }
 0xb54   : > { %p3601_p0 = scmp.ge.s32.totalorder %s2962_s24, 2  ;;  %s2052_s16 = scalar_lea.sflag [#allocation5], %s2051_s1 }
 0xb56   : > { %p2626_p2 = pnand %p3601_p0, %p3600_p13 }
 0xb58   : > { %2945 = dma.done.wait (!%p2626_p2), %s2052_s16, 512  }
 0xb59   : > { %2947 = vsyncadd (!%p2626_p2), %s2052_s16, 4294966784  ;;  %p28_p8 = scmp.ge.s32.totalorder %s3211_s25, 4   ;;  %s3602_s21 = smov %s2954_s22 }
 0xb5a   : > { %s3603_s22 = smov %s2958_s23  ;;  %s3604_s23 = smov %s3223_s29 }
 0xb5b   : > { %s3605_s24 = smov %s3211_s25  ;;  %30 = sbr.rel (!%p28_p8) target bundleno = 14 (0xe), region = 139 }
 0xb62   :  { %2057 = vsyncpa [#allocation4], 1 }
 0xb63   :  { %2059 = vsyncpa [#allocation4 + $0x1], 1 }
 0xb64   :  { %2060 = vsyncpa [#allocation7], 1 }
 0xb65   :  { %2061 = vsyncpa [#allocation10], 1 }
 0xb66   :  { %2062 = vsyncpa [#allocation13], 1 }
 0xb67   :  { %2063 = vsyncpa [#allocation5], 1 }
 0xb68   :  { %2065 = vsyncpa [#allocation5 + $0x1], 1 }

</bundles_post_ra>
